<compile_context>
chip_gen: v5e
topology: v5e:2x2
jax: 0.10.0
libtpu: 0.0.40
codegen_flags: <defaults>
</compile_context>

<pallas_src>
import functools

import jax
import jax.numpy as jnp
from jax import lax
from jax.experimental import pallas as pl
from jax.experimental.pallas import tpu as pltpu


_SUB = 8      # sublanes per vreg -> batch rows folded per grid step
_LANE = 128   # lanes per vreg     -> halo depth / alignment quantum


def _round_up(x, m):
    return ((x + m - 1) // m) * m


def _wh_kernel(a_ref, w1_ref, w2_ref, x_ref, o_ref, xbuf, ybuf,
               *, K, P, L1, L2, S, Wot):
    """One (8-batch-rows, Wot-lane) tile per grid step, all F filters.

    a_ref:  SMEM (3,)          nonlinearity coefficients a0, a1, a2
    w1_ref: VMEM (K, F, 1, 1)  conv1 weight; w1_ref[k] is an (F,1,1) column
    w2_ref: VMEM (K, F, 1, 1)  conv2 weight; same layout
    x_ref:  VMEM (8, Wot)      current x tile (8 batch rows on sublanes)
    o_ref:  VMEM (8, Wot)      lane-dense output tile (shifted by S lanes)
    xbuf:   VMEM (8, Wot+128)  [carried left halo | current x tile]
    ybuf:   VMEM (F, 8, Wot+128) scratch holding the nonlinearity output

    Global index convention: output lane m of time-tile t is sample
    j = t*Wot + m - S; it needs input frame samples [j, j + 2K-2], i.e. xbuf
    lanes [m + 128 - S, m + 128] -- always inside [halo | tile].
    """
    t = pl.program_id(1)
    Wh = Wot + K - 1                      # width of the intermediate slab

    # scalar reads hoisted out of all loops
    a0 = a_ref[0]
    a1 = a_ref[1]
    a2 = a_ref[2]

    # ---- stage the x tile next to the carried left halo --------------------
    @pl.when(t == 0)
    def _():                              # first tile: halo is conceptual zeros
        xbuf[:, :_LANE] = jnp.zeros((_SUB, _LANE), jnp.float32)

    xbuf[:, _LANE:] = x_ref[...]          # aligned (8, Wot) VMEM store

    # ---- conv1: all F filters & 8 batch rows at once ------------------------
    # Shifted windows are *Ref* reads (vld), not slices of in-register values.
    base = _LANE - S
    h = w1_ref[0] * xbuf[:, base:base + Wh]          # (F,1,1)*(8,Wh)->(F,8,Wh)
    for k in range(1, K):                 # K is tiny & static: fully unrolled
        h = h + w1_ref[k] * xbuf[:, base + k:base + k + Wh]

    # zero padding between the convs (torch zero-pads the conv2 input);
    # mask computed once per step, broadcast over filters/batch.
    u = lax.broadcasted_iota(jnp.int32, (1, 1, Wh), 2) + (t * Wot - S)
    h = jnp.where((u >= P) & (u < P + L1), h, 0.0)

    # memoryless polynomial nonlinearity, Horner form (maps 0 -> 0, so the
    # zero padding is preserved)
    y = h * (a0 + h * (a1 + a2 * h))                 # (F, 8, Wh)

    # ---- conv2: stash y in VMEM, read shifted windows back as Refs ----------
    ybuf[:, :, :Wh] = y
    acc = w2_ref[0] * ybuf[:, :, 0:Wot]              # (F, 8, Wot)
    for k in range(1, K):
        acc = acc + w2_ref[k] * ybuf[:, :, k:k + Wot]

    out = jnp.sum(acc, axis=0)                       # reduce filters -> (8, Wot)

    # mask lanes outside the valid output range so the padded frame is clean
    j = lax.broadcasted_iota(jnp.int32, (_SUB, Wot), 1) + (t * Wot - S)
    o_ref[...] = jnp.where((j >= 0) & (j < L2), out, 0.0)

    # carry the tail of this x tile as the next time-tile's left halo
    xbuf[:, :_LANE] = xbuf[:, Wot:Wot + _LANE]


def wh_channel_net(x, w1, w2, a, filter_length, *, time_tile=2048):
    """x: (N, 1, L); w1: (F, 1, K); w2: (1, F, K); a: (3,).

    Returns (N, 1, L2), matching torch Conv1d length arithmetic.
    """
    N, C, L = x.shape
    assert C == 1
    K = int(filter_length)
    assert 1 <= K <= 65, "halo framing assumes the conv halo fits in 128 lanes"
    F = w1.shape[0]
    P = K // 2
    S = 2 * K - 2                   # output lane shift = left-halo depth needed
    L1 = L + 2 * P - K + 1          # conv1 output length
    L2 = L1 + 2 * P - K + 1         # conv2 output length

    # ---- lane-dense frame / tile geometry ----
    needed = S + L2                                    # shifted output frame
    Wot = min(_round_up(needed, _LANE), _round_up(time_tile, _LANE))
    nt = pl.cdiv(needed, Wot)                          # time tiles
    Wtot = nt * Wot

    Np = _round_up(N, _SUB)                            # batch padded to 8 rows
    nb = Np // _SUB

    # Input frame: signal at lane offset 2P (conv1 zero padding + frame
    # offset), batch padded to a multiple of 8 sublanes, zero-filled to Wtot.
    x2 = x[:, 0, :].astype(jnp.float32)
    xin = jnp.pad(x2, ((0, Np - N), (2 * P, Wtot - L - 2 * P)))

    # Weights as (K, F, 1, 1): w*_ref[k] is an (F,1,1) column that broadcasts
    # over (sublanes, lanes) in-kernel (wrapper-side layout plumbing).
    w1k = jnp.transpose(w1[:, 0, :].astype(jnp.float32), (1, 0))[:, :, None, None]
    w2k = jnp.transpose(w2[0, :, :].astype(jnp.float32), (1, 0))[:, :, None, None]
    a = a.astype(jnp.float32)

    kernel = functools.partial(_wh_kernel, K=K, P=P, L1=L1, L2=L2, S=S, Wot=Wot)

    # Explicit VMEM budget: x/out double-buffered blocks + xbuf + ybuf +
    # in-flight (F,8,Wh) slab + padded weight tiles, with headroom.  Capped at
    # 32 MiB -> safe on v5e (16 MiB default scoped), v6e and v7x (64 MiB phys).
    vmem_elems = (2 * 2 * _SUB * Wot                  # x + out, double-buffered
                  + _SUB * (Wot + _LANE)              # xbuf
                  + 2 * F * _SUB * (Wot + _LANE)      # ybuf + live h/y slab
                  + 2 * K * F * _SUB * _LANE)         # padded weight tiles
    vmem_limit = int(min(max(3 * 4 * vmem_elems, 8 << 20), 32 << 20))

    out = pl.pallas_call(
        kernel,
        out_shape=jax.ShapeDtypeStruct((Np, Wtot), jnp.float32),
        grid=(nb, nt),
        in_specs=[
            pl.BlockSpec(memory_space=pltpu.MemorySpace.SMEM),        # a (3,)
            pl.BlockSpec((K, F, 1, 1), lambda b, t: (0, 0, 0, 0)),    # w1 resident
            pl.BlockSpec((K, F, 1, 1), lambda b, t: (0, 0, 0, 0)),    # w2 resident
            pl.BlockSpec((_SUB, Wot), lambda b, t: (b, t)),           # x tile
        ],
        out_specs=pl.BlockSpec((_SUB, Wot), lambda b, t: (b, t)),
        scratch_shapes=[
            pltpu.VMEM((_SUB, Wot + _LANE), jnp.float32),             # xbuf
            pltpu.VMEM((F, _SUB, Wot + _LANE), jnp.float32),          # ybuf
        ],
        compiler_params=pltpu.CompilerParams(
            dimension_semantics=("parallel", "arbitrary"),
            vmem_limit_bytes=vmem_limit),
    )(a, w1k, w2k, xin)

    # Single wrapper slice: drops the S-lane shift and the batch padding.
    # The padded tail lanes are already zeroed in-kernel, so a consumer could
    # also use the padded (Np, Wtot) frame directly and skip this copy.
    return out[:N, S:S + L2][:, None, :]


def _reference(x, w1, w2, a, K):
    """Pure-JAX reference (lax conv == torch Conv1d cross-correlation)."""
    P = K // 2
    dn = ('NCH', 'OIH', 'NCH')
    h = lax.conv_general_dilated(x, w1, window_strides=(1,),
                                 padding=[(P, P)], dimension_numbers=dn)
    y = a[0] * h + a[1] * h ** 2 + a[2] * h ** 3
    return lax.conv_general_dilated(y, w2, window_strides=(1,),
                                    padding=[(P, P)], dimension_numbers=dn)


def _xavier_uniform(key, shape):
    out_ch, in_ch, k = shape
    fan_in, fan_out = in_ch * k, out_ch * k
    bound = (6.0 / (fan_in + fan_out)) ** 0.5
    return jax.random.uniform(key, shape, jnp.float32, -bound, bound)


if __name__ == "__main__":
    key = jax.random.PRNGKey(0)
    k_x, k_w1, k_w2, k_xb = jax.random.split(key, 4)

    # Small shapes consistent with the module: batch=2, in_channels=1, L=16.
    N, L = 2, 16
    filter_length, num_filters = 5, 8

    x = jax.random.normal(k_x, (N, 1, L), jnp.float32)
    w1 = _xavier_uniform(k_w1, (num_filters, 1, filter_length))
    w2 = _xavier_uniform(k_w2, (1, num_filters, filter_length))
    # module default init (0,0,0) gives an identically zero output; use
    # non-trivial coefficients (the module accepts them as an argument).
    a = jnp.array([1.0, 0.25, -0.1], jnp.float32)

    out = jax.block_until_ready(wh_channel_net(x, w1, w2, a, filter_length))
    ref = _reference(x, w1, w2, a, filter_length)
    assert out.shape == ref.shape, (out.shape, ref.shape)
    assert jnp.allclose(out, ref, rtol=1e-4, atol=1e-5), \
        float(jnp.max(jnp.abs(out - ref)))

    # Second check: exercises the multi-time-tile halo carry and the
    # multi-batch-tile path (still small / fast).
    Nb, Lb = 10, 1000
    xb = jax.random.normal(k_xb, (Nb, 1, Lb), jnp.float32)
    outb = jax.block_until_ready(
        wh_channel_net(xb, w1, w2, a, filter_length, time_tile=256))
    refb = _reference(xb, w1, w2, a, filter_length)
    assert outb.shape == refb.shape, (outb.shape, refb.shape)
    assert jnp.allclose(outb, refb, rtol=1e-4, atol=1e-4), \
        float(jnp.max(jnp.abs(outb - refb)))

    print("KERNEL_OK")
</pallas_src>

<mosaic_0001>
module attributes {stable_mosaic.version = 11 : i64} {
  func.func @_wh_kernel(%arg0: i32, %arg1: i32, %arg2: memref<3xf32, #tpu.memory_space<smem>>, %arg3: memref<5x8x1x1xf32, #tpu.memory_space<vmem>>, %arg4: memref<5x8x1x1xf32, #tpu.memory_space<vmem>>, %arg5: memref<8x128xf32, #tpu.memory_space<vmem>>, %arg6: memref<8x128xf32, #tpu.memory_space<vmem>>, %arg7: memref<8x256xf32, #tpu.memory_space<vmem>>, %arg8: memref<8x8x256xf32, #tpu.memory_space<vmem>>) attributes {dimension_semantics = [#tpu.dimension_semantics<parallel>, #tpu.dimension_semantics<arbitrary>], iteration_bounds = array<i64: 1, 1>, scalar_prefetch = 0 : i64, scratch_operands = 2 : i64, tpu.core_type = #tpu.core_type<tc>, window_params = [{transform_indices = @transform_0, window_bounds = array<i64: 3>}, {pipeline_mode = #tpu.pipeline_mode<synchronous>, transform_indices = @transform_1, window_bounds = array<i64: 5, 8, 1, 1>}, {pipeline_mode = #tpu.pipeline_mode<synchronous>, transform_indices = @transform_2, window_bounds = array<i64: 5, 8, 1, 1>}, {transform_indices = @transform_3, window_bounds = array<i64: 8, 128>}, {transform_indices = @transform_4, window_bounds = array<i64: 8, 128>}]} {
    %c0 = arith.constant 0 : index
    %0 = memref.load %arg2[%c0] : memref<3xf32, #tpu.memory_space<smem>>
    %c1 = arith.constant 1 : index
    %1 = memref.load %arg2[%c1] : memref<3xf32, #tpu.memory_space<smem>>
    %c2 = arith.constant 2 : index
    %2 = memref.load %arg2[%c2] : memref<3xf32, #tpu.memory_space<smem>>
    %c0_i32 = arith.constant 0 : i32
    %3 = arith.cmpi eq, %arg1, %c0_i32 : i32
    %4 = arith.extui %3 : i1 to i32
    %c0_i32_0 = arith.constant 0 : i32
    %5 = arith.cmpi ne, %4, %c0_i32_0 : i32
    scf.if %5 {
      %cst_76 = arith.constant 0.000000e+00 : f32
      %115 = vector.broadcast %cst_76 : f32 to vector<8x128xf32>
      %c0_77 = arith.constant 0 : index
      %c0_78 = arith.constant 0 : index
      %116 = vector.load %arg7[%c0_77, %c0_78] : memref<8x256xf32, #tpu.memory_space<vmem>>, vector<8x128xf32>
      tpu.vector_store %arg7[%c0_77, %c0_78], %115 {strides = array<i32>} : memref<8x256xf32, #tpu.memory_space<vmem>>, vector<8x128xf32>,
    } else {
    }
    %c0_1 = arith.constant 0 : index
    %c0_2 = arith.constant 0 : index
    %6 = vector.load %arg5[%c0_1, %c0_2] : memref<8x128xf32, #tpu.memory_space<vmem>>, vector<8x128xf32>
    %c0_3 = arith.constant 0 : index
    %c128 = arith.constant 128 : index
    %7 = vector.load %arg7[%c0_3, %c128] : memref<8x256xf32, #tpu.memory_space<vmem>>, vector<8x128xf32>
    tpu.vector_store %arg7[%c0_3, %c128], %6 {strides = array<i32>} : memref<8x256xf32, #tpu.memory_space<vmem>>, vector<8x128xf32>,
    %c0_4 = arith.constant 0 : index
    %c0_5 = arith.constant 0 : index
    %c0_6 = arith.constant 0 : index
    %c0_7 = arith.constant 0 : index
    %8 = vector.load %arg3[%c0_4, %c0_5, %c0_6, %c0_7] : memref<5x8x1x1xf32, #tpu.memory_space<vmem>>, vector<1x8x1x1xf32>
    %9 = vector.shape_cast %8 : vector<1x8x1x1xf32> to vector<8x1x1xf32>
    %c0_8 = arith.constant 0 : index
    %c120 = arith.constant 120 : index
    %10 = vector.load %arg7[%c0_8, %c120] : memref<8x256xf32, #tpu.memory_space<vmem>>, vector<8x132xf32>
    %11 = vector.shape_cast %10 : vector<8x132xf32> to vector<1x8x132xf32>
    %12 = vector.broadcast %9 : vector<8x1x1xf32> to vector<8x8x132xf32>
    %13 = vector.broadcast %11 : vector<1x8x132xf32> to vector<8x8x132xf32>
    %14 = arith.mulf %12, %13 : vector<8x8x132xf32>
    %c1_9 = arith.constant 1 : index
    %c0_10 = arith.constant 0 : index
    %c0_11 = arith.constant 0 : index
    %c0_12 = arith.constant 0 : index
    %15 = vector.load %arg3[%c1_9, %c0_10, %c0_11, %c0_12] : memref<5x8x1x1xf32, #tpu.memory_space<vmem>>, vector<1x8x1x1xf32>
    %16 = vector.shape_cast %15 : vector<1x8x1x1xf32> to vector<8x1x1xf32>
    %c0_13 = arith.constant 0 : index
    %c121 = arith.constant 121 : index
    %17 = vector.load %arg7[%c0_13, %c121] : memref<8x256xf32, #tpu.memory_space<vmem>>, vector<8x132xf32>
    %18 = vector.shape_cast %17 : vector<8x132xf32> to vector<1x8x132xf32>
    %19 = vector.broadcast %16 : vector<8x1x1xf32> to vector<8x8x132xf32>
    %20 = vector.broadcast %18 : vector<1x8x132xf32> to vector<8x8x132xf32>
    %21 = arith.mulf %19, %20 : vector<8x8x132xf32>
    %22 = arith.addf %14, %21 : vector<8x8x132xf32>
    %c2_14 = arith.constant 2 : index
    %c0_15 = arith.constant 0 : index
    %c0_16 = arith.constant 0 : index
    %c0_17 = arith.constant 0 : index
    %23 = vector.load %arg3[%c2_14, %c0_15, %c0_16, %c0_17] : memref<5x8x1x1xf32, #tpu.memory_space<vmem>>, vector<1x8x1x1xf32>
    %24 = vector.shape_cast %23 : vector<1x8x1x1xf32> to vector<8x1x1xf32>
    %c0_18 = arith.constant 0 : index
    %c122 = arith.constant 122 : index
    %25 = vector.load %arg7[%c0_18, %c122] : memref<8x256xf32, #tpu.memory_space<vmem>>, vector<8x132xf32>
    %26 = vector.shape_cast %25 : vector<8x132xf32> to vector<1x8x132xf32>
    %27 = vector.broadcast %24 : vector<8x1x1xf32> to vector<8x8x132xf32>
    %28 = vector.broadcast %26 : vector<1x8x132xf32> to vector<8x8x132xf32>
    %29 = arith.mulf %27, %28 : vector<8x8x132xf32>
    %30 = arith.addf %22, %29 : vector<8x8x132xf32>
    %c3 = arith.constant 3 : index
    %c0_19 = arith.constant 0 : index
    %c0_20 = arith.constant 0 : index
    %c0_21 = arith.constant 0 : index
    %31 = vector.load %arg3[%c3, %c0_19, %c0_20, %c0_21] : memref<5x8x1x1xf32, #tpu.memory_space<vmem>>, vector<1x8x1x1xf32>
    %32 = vector.shape_cast %31 : vector<1x8x1x1xf32> to vector<8x1x1xf32>
    %c0_22 = arith.constant 0 : index
    %c123 = arith.constant 123 : index
    %33 = vector.load %arg7[%c0_22, %c123] : memref<8x256xf32, #tpu.memory_space<vmem>>, vector<8x132xf32>
    %34 = vector.shape_cast %33 : vector<8x132xf32> to vector<1x8x132xf32>
    %35 = vector.broadcast %32 : vector<8x1x1xf32> to vector<8x8x132xf32>
    %36 = vector.broadcast %34 : vector<1x8x132xf32> to vector<8x8x132xf32>
    %37 = arith.mulf %35, %36 : vector<8x8x132xf32>
    %38 = arith.addf %30, %37 : vector<8x8x132xf32>
    %c4 = arith.constant 4 : index
    %c0_23 = arith.constant 0 : index
    %c0_24 = arith.constant 0 : index
    %c0_25 = arith.constant 0 : index
    %39 = vector.load %arg3[%c4, %c0_23, %c0_24, %c0_25] : memref<5x8x1x1xf32, #tpu.memory_space<vmem>>, vector<1x8x1x1xf32>
    %40 = vector.shape_cast %39 : vector<1x8x1x1xf32> to vector<8x1x1xf32>
    %c0_26 = arith.constant 0 : index
    %c124 = arith.constant 124 : index
    %41 = vector.load %arg7[%c0_26, %c124] : memref<8x256xf32, #tpu.memory_space<vmem>>, vector<8x132xf32>
    %42 = vector.shape_cast %41 : vector<8x132xf32> to vector<1x8x132xf32>
    %43 = vector.broadcast %40 : vector<8x1x1xf32> to vector<8x8x132xf32>
    %44 = vector.broadcast %42 : vector<1x8x132xf32> to vector<8x8x132xf32>
    %45 = arith.mulf %43, %44 : vector<8x8x132xf32>
    %46 = arith.addf %38, %45 : vector<8x8x132xf32>
    %47 = tpu.iota {dimensions = array<i32: 2>} : vector<1x1x132xi32>
    %c128_i32 = arith.constant 128 : i32
    %48 = arith.muli %arg1, %c128_i32 : i32
    %c8_i32 = arith.constant 8 : i32
    %49 = arith.subi %48, %c8_i32 : i32
    %50 = vector.broadcast %49 : i32 to vector<1x1x132xi32>
    %51 = arith.addi %47, %50 : vector<1x1x132xi32>
    %c2_i32 = arith.constant 2 : i32
    %52 = vector.broadcast %c2_i32 : i32 to vector<1x1x132xi32>
    %53 = arith.cmpi sge, %51, %52 : vector<1x1x132xi32>
    %c18_i32 = arith.constant 18 : i32
    %54 = vector.broadcast %c18_i32 : i32 to vector<1x1x132xi32>
    %55 = arith.cmpi slt, %51, %54 : vector<1x1x132xi32>
    %56 = arith.andi %53, %55 : vector<1x1x132xi1>
    %cst = arith.constant 0.000000e+00 : f32
    %57 = vector.shape_cast %56 : vector<1x1x132xi1> to vector<1x1x132xi1>
    %58 = vector.broadcast %57 : vector<1x1x132xi1> to vector<8x8x132xi1>
    %59 = vector.broadcast %cst : f32 to vector<8x8x132xf32>
    %60 = arith.select %58, %46, %59 : vector<8x8x132xi1>, vector<8x8x132xf32>
    %61 = vector.broadcast %2 : f32 to vector<8x8x132xf32>
    %62 = arith.mulf %61, %60 : vector<8x8x132xf32>
    %63 = vector.broadcast %1 : f32 to vector<8x8x132xf32>
    %64 = arith.addf %63, %62 : vector<8x8x132xf32>
    %65 = arith.mulf %60, %64 : vector<8x8x132xf32>
    %66 = vector.broadcast %0 : f32 to vector<8x8x132xf32>
    %67 = arith.addf %66, %65 : vector<8x8x132xf32>
    %68 = arith.mulf %60, %67 : vector<8x8x132xf32>
    %c0_27 = arith.constant 0 : index
    %c0_28 = arith.constant 0 : index
    %c0_29 = arith.constant 0 : index
    %69 = vector.load %arg8[%c0_27, %c0_28, %c0_29] : memref<8x8x256xf32, #tpu.memory_space<vmem>>, vector<8x8x132xf32>
    tpu.vector_store %arg8[%c0_27, %c0_28, %c0_29], %68 {strides = array<i32>} : memref<8x8x256xf32, #tpu.memory_space<vmem>>, vector<8x8x132xf32>,
    %c0_30 = arith.constant 0 : index
    %c0_31 = arith.constant 0 : index
    %c0_32 = arith.constant 0 : index
    %c0_33 = arith.constant 0 : index
    %70 = vector.load %arg4[%c0_30, %c0_31, %c0_32, %c0_33] : memref<5x8x1x1xf32, #tpu.memory_space<vmem>>, vector<1x8x1x1xf32>
    %71 = vector.shape_cast %70 : vector<1x8x1x1xf32> to vector<8x1x1xf32>
    %c0_34 = arith.constant 0 : index
    %c0_35 = arith.constant 0 : index
    %c0_36 = arith.constant 0 : index
    %72 = vector.load %arg8[%c0_34, %c0_35, %c0_36] : memref<8x8x256xf32, #tpu.memory_space<vmem>>, vector<8x8x128xf32>
    %73 = vector.broadcast %71 : vector<8x1x1xf32> to vector<8x8x128xf32>
    %74 = arith.mulf %73, %72 : vector<8x8x128xf32>
    %c1_37 = arith.constant 1 : index
    %c0_38 = arith.constant 0 : index
    %c0_39 = arith.constant 0 : index
    %c0_40 = arith.constant 0 : index
    %75 = vector.load %arg4[%c1_37, %c0_38, %c0_39, %c0_40] : memref<5x8x1x1xf32, #tpu.memory_space<vmem>>, vector<1x8x1x1xf32>
    %76 = vector.shape_cast %75 : vector<1x8x1x1xf32> to vector<8x1x1xf32>
    %c0_41 = arith.constant 0 : index
    %c0_42 = arith.constant 0 : index
    %c1_43 = arith.constant 1 : index
    %77 = vector.load %arg8[%c0_41, %c0_42, %c1_43] : memref<8x8x256xf32, #tpu.memory_space<vmem>>, vector<8x8x128xf32>
    %78 = vector.broadcast %76 : vector<8x1x1xf32> to vector<8x8x128xf32>
    %79 = arith.mulf %78, %77 : vector<8x8x128xf32>
    %80 = arith.addf %74, %79 : vector<8x8x128xf32>
    %c2_44 = arith.constant 2 : index
    %c0_45 = arith.constant 0 : index
    %c0_46 = arith.constant 0 : index
    %c0_47 = arith.constant 0 : index
    %81 = vector.load %arg4[%c2_44, %c0_45, %c0_46, %c0_47] : memref<5x8x1x1xf32, #tpu.memory_space<vmem>>, vector<1x8x1x1xf32>
    %82 = vector.shape_cast %81 : vector<1x8x1x1xf32> to vector<8x1x1xf32>
    %c0_48 = arith.constant 0 : index
    %c0_49 = arith.constant 0 : index
    %c2_50 = arith.constant 2 : index
    %83 = vector.load %arg8[%c0_48, %c0_49, %c2_50] : memref<8x8x256xf32, #tpu.memory_space<vmem>>, vector<8x8x128xf32>
    %84 = vector.broadcast %82 : vector<8x1x1xf32> to vector<8x8x128xf32>
    %85 = arith.mulf %84, %83 : vector<8x8x128xf32>
    %86 = arith.addf %80, %85 : vector<8x8x128xf32>
    %c3_51 = arith.constant 3 : index
    %c0_52 = arith.constant 0 : index
    %c0_53 = arith.constant 0 : index
    %c0_54 = arith.constant 0 : index
    %87 = vector.load %arg4[%c3_51, %c0_52, %c0_53, %c0_54] : memref<5x8x1x1xf32, #tpu.memory_space<vmem>>, vector<1x8x1x1xf32>
    %88 = vector.shape_cast %87 : vector<1x8x1x1xf32> to vector<8x1x1xf32>
    %c0_55 = arith.constant 0 : index
    %c0_56 = arith.constant 0 : index
    %c3_57 = arith.constant 3 : index
    %89 = vector.load %arg8[%c0_55, %c0_56, %c3_57] : memref<8x8x256xf32, #tpu.memory_space<vmem>>, vector<8x8x128xf32>
    %90 = vector.broadcast %88 : vector<8x1x1xf32> to vector<8x8x128xf32>
    %91 = arith.mulf %90, %89 : vector<8x8x128xf32>
    %92 = arith.addf %86, %91 : vector<8x8x128xf32>
    %c4_58 = arith.constant 4 : index
    %c0_59 = arith.constant 0 : index
    %c0_60 = arith.constant 0 : index
    %c0_61 = arith.constant 0 : index
    %93 = vector.load %arg4[%c4_58, %c0_59, %c0_60, %c0_61] : memref<5x8x1x1xf32, #tpu.memory_space<vmem>>, vector<1x8x1x1xf32>
    %94 = vector.shape_cast %93 : vector<1x8x1x1xf32> to vector<8x1x1xf32>
    %c0_62 = arith.constant 0 : index
    %c0_63 = arith.constant 0 : index
    %c4_64 = arith.constant 4 : index
    %95 = vector.load %arg8[%c0_62, %c0_63, %c4_64] : memref<8x8x256xf32, #tpu.memory_space<vmem>>, vector<8x8x128xf32>
    %96 = vector.broadcast %94 : vector<8x1x1xf32> to vector<8x8x128xf32>
    %97 = arith.mulf %96, %95 : vector<8x8x128xf32>
    %98 = arith.addf %92, %97 : vector<8x8x128xf32>
    %cst_65 = arith.constant dense<0.000000e+00> : vector<8x128xf32>
    %99 = vector.multi_reduction <add>, %98, %cst_65 [0] : vector<8x8x128xf32> to vector<8x128xf32>
    %100 = tpu.iota {dimensions = array<i32: 1>} : vector<8x128xi32>
    %c128_i32_66 = arith.constant 128 : i32
    %101 = arith.muli %arg1, %c128_i32_66 : i32
    %c8_i32_67 = arith.constant 8 : i32
    %102 = arith.subi %101, %c8_i32_67 : i32
    %103 = vector.broadcast %102 : i32 to vector<8x128xi32>
    %104 = arith.addi %100, %103 : vector<8x128xi32>
    %c0_i32_68 = arith.constant 0 : i32
    %105 = vector.broadcast %c0_i32_68 : i32 to vector<8x128xi32>
    %106 = arith.cmpi sge, %104, %105 : vector<8x128xi32>
    %c16_i32 = arith.constant 16 : i32
    %107 = vector.broadcast %c16_i32 : i32 to vector<8x128xi32>
    %108 = arith.cmpi slt, %104, %107 : vector<8x128xi32>
    %109 = arith.andi %106, %108 : vector<8x128xi1>
    %cst_69 = arith.constant 0.000000e+00 : f32
    %110 = vector.broadcast %cst_69 : f32 to vector<8x128xf32>
    %111 = arith.select %109, %99, %110 : vector<8x128xi1>, vector<8x128xf32>
    %c0_70 = arith.constant 0 : index
    %c0_71 = arith.constant 0 : index
    %112 = vector.load %arg6[%c0_70, %c0_71] : memref<8x128xf32, #tpu.memory_space<vmem>>, vector<8x128xf32>
    tpu.vector_store %arg6[%c0_70, %c0_71], %111 {strides = array<i32>} : memref<8x128xf32, #tpu.memory_space<vmem>>, vector<8x128xf32>,
    %c0_72 = arith.constant 0 : index
    %c128_73 = arith.constant 128 : index
    %113 = vector.load %arg7[%c0_72, %c128_73] : memref<8x256xf32, #tpu.memory_space<vmem>>, vector<8x128xf32>
    %c0_74 = arith.constant 0 : index
    %c0_75 = arith.constant 0 : index
    %114 = vector.load %arg7[%c0_74, %c0_75] : memref<8x256xf32, #tpu.memory_space<vmem>>, vector<8x128xf32>
    tpu.vector_store %arg7[%c0_74, %c0_75], %113 {strides = array<i32>} : memref<8x256xf32, #tpu.memory_space<vmem>>, vector<8x128xf32>,
    return
  }
  func.func @transform_0(%arg0: i32, %arg1: i32) -> i32 {
    %c0_i32 = arith.constant 0 : i32
    %c0_i32_0 = arith.constant 0 : i32
    return %c0_i32 : i32
  }
  func.func @transform_1(%arg0: i32, %arg1: i32) -> (i32, i32, i32, i32) {
    %c0_i32 = arith.constant 0 : i32
    %c0_i32_0 = arith.constant 0 : i32
    %c0_i32_1 = arith.constant 0 : i32
    %c0_i32_2 = arith.constant 0 : i32
    %c0_i32_3 = arith.constant 0 : i32
    return %c0_i32, %c0_i32_0, %c0_i32_1, %c0_i32_2 : i32, i32, i32, i32
  }
  func.func @transform_2(%arg0: i32, %arg1: i32) -> (i32, i32, i32, i32) {
    %c0_i32 = arith.constant 0 : i32
    %c0_i32_0 = arith.constant 0 : i32
    %c0_i32_1 = arith.constant 0 : i32
    %c0_i32_2 = arith.constant 0 : i32
    %c0_i32_3 = arith.constant 0 : i32
    return %c0_i32, %c0_i32_0, %c0_i32_1, %c0_i32_2 : i32, i32, i32, i32
  }
  func.func @transform_3(%arg0: i32, %arg1: i32) -> (i32, i32) {
    %c0_i32 = arith.constant 0 : i32
    return %arg0, %arg1 : i32, i32
  }
  func.func @transform_4(%arg0: i32, %arg1: i32) -> (i32, i32) {
    %c0_i32 = arith.constant 0 : i32
    return %arg0, %arg1 : i32, i32
  }
}

</mosaic_0001>

<bundles_post_ra>
// kernel: tpu_custom_call.1
= control target key start
LH: loop header
LB: loop body
LE: loop exit
PB: predicated region body
PF: predicated region fallthrough
CT: control target
= control target key end

     0   :  { %9 = vsyncpa [#allocation6], 0  ;;  %s2869_s0 = inlined_call_operand.vmem [shape: f32[3], index: 0, kind: input, shape index: {}]   ;;  %s2870_s1 = inlined_call_operand.vmem [shape: f32[5,8,1,1], index: 1, kind: input, shape index: {}]   ;;  %s2871_s2 = inlined_call_operand.vmem [shape: f32[5,8,1,1], index: 2, kind: input, shape index: {}]   ;;  %s2872_s3 = inlined_call_operand.vmem [shape: f32[8,128], index: 3, kind: input, shape index: {}]   ;;  %s2873_s4 = inlined_call_operand.hbm [shape: f32[8,128], index: 4, kind: output, shape index: {}]  }
   0x1   :  { %10 = vsyncpa [#allocation5], 0  ;;  %s16_s17 = sshll.u32 %s2869_s0, 4  ;;  %s1866_s18 = smov [#allocation4]   ;;  %s17_s17 = int_to_ptr.vmem [resolvable:$true] %s16_s17 }
   0x2   :  { %19 = dma.vmem_to_smem %s17_s17, 16, %s1866_s18, [#allocation6]  }
   0x3   :  { %1862 = dma.done.wait [#allocation6], 16  }
   0x4   :  { %1863 = vsyncadd [#allocation6], 4294967280 }
   0x5   :  { %30 = sfence }
   0x6   :  { %v1746_v0 = vld [vmem:[%s2870_s1 + $0x4] ss:$0 sm:$0xff]  ;;  %v1867_v1 = vmov 0   ;;  %v1747_v2 = vld [vmem:[%s2870_s1 + $0x2] ss:$0 sm:$0xff]  ;;  %s1868_s15 = smov 127  }
   0x7   :  { %1745 = vset.pattern.permute.xlu2 %v1867_v1  ;;  %1744 = vset.pattern.permute.xlu1 %v1867_v1  ;;  %v1748_v3 = vld [vmem:[%s2870_s1] ss:$0 sm:$0xff]  ;;  %v1749_v4 = vld [vmem:[%s2870_s1 + $0x5] ss:$0 sm:$0xff]  ;;  %v1750_v5 = vld [vmem:[%s2870_s1 + $0x3] ss:$0 sm:$0xff] }
   0x8   :  { %1743 = vset.pattern.permute.xlu0 %v1867_v1  ;;  %84 = vperm.xlu2 %1745, %v1746_v0   ;;  %v1751_v6 = vld [vmem:[%s2870_s1 + $0x1] ss:$0 sm:$0xff]  ;;  %v1752_v7 = vld [vmem:[%s2870_s1 + $0x8] ss:$0 sm:$0xff]  ;;  %v1753_v8 = vld [vmem:[%s2870_s1 + $0x7] ss:$0 sm:$0xff] }
   0x9   :  { %76 = vperm.xlu1 %1744, %v1747_v2   ;;  %68 = vperm.xlu0 %1743, %v1748_v3   ;;  %v1754_v9 = vld [vmem:[%s2870_s1 + $0x6] ss:$0 sm:$0xff]  ;;  %v1755_v10 = vld [vmem:[%s2870_s1 + $0xb] ss:$0 sm:$0xff]  ;;  %v1756_v11 = vld [vmem:[%s2870_s1 + $0xa] ss:$0 sm:$0xff] }
   0xa   :  { %v1757_v12 = vld [vmem:[%s2870_s1 + $0x9] ss:$0 sm:$0xff]  ;;  %v1758_v13 = vld [vmem:[%s2870_s1 + $0xe] ss:$0 sm:$0xff]  ;;  %v1759_v14 = vld [vmem:[%s2870_s1 + $0xd] ss:$0 sm:$0xff] }
   0xb   :  { %v1760_v15 = vld [vmem:[%s2870_s1 + $0xc] ss:$0 sm:$0xff]  ;;  %v1761_v16 = vld [vmem:[%s2870_s1 + $0x10] ss:$0 sm:$0xff]  ;;  %v1762_v17 = vld [vmem:[%s2870_s1 + $0x12] ss:$0 sm:$0xff] }
   0xc   :  { %v1763_v18 = vld [vmem:[%s2870_s1 + $0xf] ss:$0 sm:$0xff]  ;;  %v1764_v19 = vld [vmem:[%s2870_s1 + $0x13] ss:$0 sm:$0xff]  ;;  %v1765_v20 = vld [vmem:[%s2870_s1 + $0x15] ss:$0 sm:$0xff] }
   0xd   :  { %v1766_v21 = vld [vmem:[%s2870_s1 + $0x11] ss:$0 sm:$0xff]  ;;  %v1767_v22 = vld [vmem:[%s2870_s1 + $0x16] ss:$0 sm:$0xff]  ;;  %v1768_v23 = vld [vmem:[%s2870_s1 + $0x14] ss:$0 sm:$0xff] }
   0xe   :  { %v1769_v24 = vld [vmem:[%s2870_s1 + $0x17] ss:$0 sm:$0xff]  ;;  %v1981_v27 = vld [vmem:[%s2872_s3] sm:$0xff]  ;;  %s1869_s3 = smov 126   ;;  %s1870_s5 = smov 125   ;;  %vm560_vm0 = vcmask 1022976  }
   0xf   :  { %s1872_s0 = smov 8   ;;  %vm236_vm1 = vcmask 1039360   ;;  %vm398_vm2 = vcmask 1031168   ;;  %vm722_vm3 = vcmask 1014784   ;;  %s1670_s17 = sld [smem:[#allocation4 + $0x2]]  ;;  %vm829_vm6 = vcmask 64512  }
  0x10   :  { %88 = vperm.xlu2 %1745, %v1749_v4   ;;  %s1669_s23 = sld [smem:[#allocation4 + $0x1]]  ;;  %vm954_vm8 = vcmask 31744   ;;  %s1659_s29 = sshll.u32 %s2873_s4, 4  ;;  %s1660_s29 = int_to_ptr.hbm [resolvable:$true] %s1659_s29 }
  0x11   :  { %80 = vperm.xlu1 %1744, %v1750_v5   ;;  %72 = vperm.xlu0 %1743, %v1751_v6   ;;  %s31_s24 = sld [smem:[#allocation4]] }
  0x18   :  { %141 = vperm.xlu2 %1745, %v1752_v7  }
  0x19   :  { %96 = vperm.xlu1 %1744, %v1753_v8   ;;  %92 = vperm.xlu0 %1743, %v1754_v9  }
  0x20   :  { %153 = vperm.xlu2 %1745, %v1755_v10  }
  0x21   :  { %149 = vperm.xlu1 %1744, %v1756_v11   ;;  %145 = vperm.xlu0 %1743, %v1757_v12  }
  0x28   :  { %165 = vperm.xlu2 %1745, %v1758_v13  }
  0x29   :  { %161 = vperm.xlu1 %1744, %v1759_v14   ;;  %157 = vperm.xlu0 %1743, %v1760_v15   ;;  %v1770_v15 = vld [vmem:[%s2870_s1 + $0x18] ss:$0 sm:$0xff] }
  0x30   :  { %303 = vperm.xlu2 %1745, %v1761_v16  }
  0x31   :  { %311 = vperm.xlu1 %1744, %v1762_v17   ;;  %169 = vperm.xlu0 %1743, %v1763_v18   ;;  %v1772_v18 = vld [vmem:[%s2870_s1 + $0x1b] ss:$0 sm:$0xff] }
  0x38   :  { %315 = vperm.xlu2 %1745, %v1764_v19   ;;  %v1771_v19 = vld [vmem:[%s2870_s1 + $0x19] ss:$0 sm:$0xff] }
  0x39   :  { %323 = vperm.xlu1 %1744, %v1765_v20   ;;  %307 = vperm.xlu0 %1743, %v1766_v21  }
  0x40   :  { %327 = vperm.xlu2 %1745, %v1767_v22   ;;  %v1775_v22 = vld [vmem:[%s2870_s1 + $0x1e] ss:$0 sm:$0xff] }
  0x41   :  { %319 = vperm.xlu0 %1743, %v1768_v23   ;;  %v1773_v23 = vld [vmem:[%s2870_s1 + $0x1c] ss:$0 sm:$0xff] }
  0x49   :  { %331 = vperm.xlu0 %1743, %v1769_v24   ;;  %v1774_v24 = vld [vmem:[%s2870_s1 + $0x1a] ss:$0 sm:$0xff] }
  0x62   :  { %v1974_v25 = vpop.permute.xlu2 %84 }
  0x6a   :  { %v1976_v26 = vpop.permute.xlu2 %88 }
  0x72   :  { %v142_v28 = vpop.permute.xlu2 %141 }
  0x73   :  { %v172_v29 = vmul.f32 0.0, %v142_v28  ;;  %v173_v30 = vmul.f32 %v142_v28, %v1981_v27 }
  0x75   :  { %204 = vrot.lane.b32.xlu1 %v172_v29, %s1868_s15  ;;  %206 = vrot.lane.b32.xlu2 %v173_v30, %s1868_s15  ;;  %v1776_v29 = vld [vmem:[%s2870_s1 + $0x1f] ss:$0 sm:$0xff]  ;;  %v1777_v30 = vld [vmem:[%s2870_s1 + $0x1d] ss:$0 sm:$0xff] }
  0x7a   :  { %v154_v42 = vpop.permute.xlu2 %153 }
  0x7b   :  { %v1986_v31 = vpop.permute.xlu1 %76  ;;  %v1988_v32 = vpop.permute.xlu0 %68  ;;  %v179_v43 = vmul.f32 %v154_v42, %v1981_v27  ;;  %v178_v44 = vmul.f32 0.0, %v154_v42 }
  0x82   :  { %v166_v51 = vpop.permute.xlu2 %165 }
  0x83   :  { %v1990_v33 = vpop.permute.xlu1 %80  ;;  %v1992_v34 = vpop.permute.xlu0 %72  ;;  %v185_v52 = vmul.f32 %v166_v51, %v1981_v27  ;;  %v184_v53 = vmul.f32 0.0, %v166_v51 }
  0x8a   :  { %v304_v56 = vpop.permute.xlu2 %303 }
  0x8b   :  { %v1994_v35 = vpop.permute.xlu1 %96  ;;  %v1996_v36 = vpop.permute.xlu0 %92  ;;  %v335_v57 = vmul.f32 %v304_v56, %v1981_v27  ;;  %v334_v63 = vmul.f32 0.0, %v304_v56 }
  0x92   :  { %v316_v1 = vpop.permute.xlu2 %315 }
  0x93   :  { %v150_v37 = vpop.permute.xlu1 %149  ;;  %v146_v39 = vpop.permute.xlu0 %145  ;;  %v341_v2 = vmul.f32 %v316_v1, %v1981_v27  ;;  %v340_v8 = vmul.f32 0.0, %v316_v1 }
  0x94   :  { %v176_v38 = vmul.f32 0.0, %v150_v37  ;;  %v174_v40 = vmul.f32 0.0, %v146_v39  ;;  %v175_v41 = vmul.f32 %v146_v39, %v1981_v27  ;;  %v177_v45 = vmul.f32 %v150_v37, %v1981_v27 }
  0x96   :  { %212 = vrot.lane.b32.xlu2 %v176_v38, %s1868_s15  ;;  %208 = vrot.lane.b32.xlu0 %v174_v40, %s1868_s15 }
  0x97   :  { %210 = vrot.lane.b32.xlu1 %v175_v41, %s1868_s15 }
  0x9a   :  { %v328_v10 = vpop.permute.xlu2 %327 }
  0x9b   :  { %v162_v46 = vpop.permute.xlu1 %161  ;;  %v158_v47 = vpop.permute.xlu0 %157  ;;  %v347_v11 = vmul.f32 %v328_v10, %v1981_v27  ;;  %v346_v16 = vmul.f32 0.0, %v328_v10 }
  0x9c   :  { %v182_v48 = vmul.f32 0.0, %v162_v46  ;;  %v180_v49 = vmul.f32 0.0, %v158_v47  ;;  %v181_v50 = vmul.f32 %v158_v47, %v1981_v27  ;;  %v183_v54 = vmul.f32 %v162_v46, %v1981_v27 }
  0x9e   :  { %218 = vrot.lane.b32.xlu2 %v179_v43, %s1868_s15  ;;  %214 = vrot.lane.b32.xlu0 %v177_v45, %s1868_s15 }
  0x9f   :  { %216 = vrot.lane.b32.xlu1 %v178_v44, %s1868_s15 }
  0xa3   :  { %v170_v55 = vpop.permute.xlu0 %169  ;;  %v312_v60 = vpop.permute.xlu1 %311 }
  0xa4   :  { %v186_v58 = vmul.f32 0.0, %v170_v55  ;;  %v187_v59 = vmul.f32 %v170_v55, %v1981_v27  ;;  %v338_v62 = vmul.f32 0.0, %v312_v60  ;;  %v339_v3 = vmul.f32 %v312_v60, %v1981_v27 }
  0xa6   :  { %224 = vrot.lane.b32.xlu2 %v182_v48, %s1868_s15  ;;  %220 = vrot.lane.b32.xlu0 %v180_v49, %s1868_s15 }
  0xa7   :  { %222 = vrot.lane.b32.xlu1 %v181_v50, %s1868_s15 }
  0xab   :  { %v308_v61 = vpop.permute.xlu0 %307  ;;  %v324_v5 = vpop.permute.xlu1 %323 }
  0xac   :  { %v336_v0 = vmul.f32 0.0, %v308_v61  ;;  %v337_v4 = vmul.f32 %v308_v61, %v1981_v27  ;;  %v344_v7 = vmul.f32 0.0, %v324_v5  ;;  %v345_v12 = vmul.f32 %v324_v5, %v1981_v27 }
  0xae   :  { %230 = vrot.lane.b32.xlu2 %v185_v52, %s1868_s15  ;;  %226 = vrot.lane.b32.xlu0 %v183_v54, %s1868_s15 }
  0xaf   :  { %228 = vrot.lane.b32.xlu1 %v184_v53, %s1868_s15 }
  0xb3   :  { %v320_v6 = vpop.permute.xlu0 %319 }
  0xb4   :  { %v342_v9 = vmul.f32 0.0, %v320_v6  ;;  %v343_v13 = vmul.f32 %v320_v6, %v1981_v27 }
  0xb6   :  { %368 = vrot.lane.b32.xlu2 %v335_v57, %s1869_s3  ;;  %232 = vrot.lane.b32.xlu0 %v186_v58, %s1868_s15 }
  0xb7   :  { %234 = vrot.lane.b32.xlu1 %v187_v59, %s1868_s15 }
  0xbb   :  { %v332_v14 = vpop.permute.xlu0 %331 }
  0xbc   :  { %v348_v17 = vmul.f32 0.0, %v332_v14  ;;  %v349_v20 = vmul.f32 %v332_v14, %v1981_v27 }
  0xbe   :  { %374 = vrot.lane.b32.xlu2 %v338_v62, %s1869_s3  ;;  %370 = vrot.lane.b32.xlu0 %v336_v0, %s1869_s3 }
  0xbf   :  { %366 = vrot.lane.b32.xlu1 %v334_v63, %s1869_s3 }
  0xc6   :  { %380 = vrot.lane.b32.xlu2 %v341_v2, %s1869_s3  ;;  %376 = vrot.lane.b32.xlu0 %v339_v3, %s1869_s3 }
  0xc7   :  { %372 = vrot.lane.b32.xlu1 %v337_v4, %s1869_s3 }
  0xce   :  { %386 = vrot.lane.b32.xlu2 %v344_v7, %s1869_s3  ;;  %382 = vrot.lane.b32.xlu0 %v342_v9, %s1869_s3 }
  0xcf   :  { %378 = vrot.lane.b32.xlu1 %v340_v8, %s1869_s3  ;;  %v2052_v21 = vpop.permute.xlu2 %206 }
  0xd6   :  { %392 = vrot.lane.b32.xlu2 %v347_v11, %s1869_s3  ;;  %388 = vrot.lane.b32.xlu0 %v345_v12, %s1869_s3 }
  0xd7   :  { %384 = vrot.lane.b32.xlu1 %v343_v13, %s1869_s3 }
  0xde   :  { %465 = vperm.xlu2 %1745, %v1770_v15   ;;  %394 = vrot.lane.b32.xlu0 %v348_v17, %s1869_s3 }
  0xdf   :  { %390 = vrot.lane.b32.xlu1 %v346_v16, %s1869_s3 }
  0xe6   :  { %477 = vperm.xlu2 %1745, %v1772_v18   ;;  %469 = vperm.xlu0 %1743, %v1771_v19  }
  0xe7   :  { %396 = vrot.lane.b32.xlu1 %v349_v20, %s1869_s3  ;;  %v2075_v39 = vpop.permute.xlu1 %204 }
  0xee   :  { %489 = vperm.xlu2 %1745, %v1775_v22   ;;  %481 = vperm.xlu0 %1743, %v1773_v23  }
  0xef   :  { %473 = vperm.xlu1 %1744, %v1774_v24  }
  0xf0   :  { %v2063_v28 = vpop.permute.xlu2 %212 }
  0xf6   :  { %493 = vperm.xlu0 %1743, %v1776_v29  }
  0xf7   :  { %485 = vperm.xlu1 %1744, %v1777_v30  }
  0xf8   :  { %v2071_v37 = vpop.permute.xlu2 %218 }
 0x100   :  { %v2073_v38 = vpop.permute.xlu2 %224 }
 0x108   :  { %v2077_v40 = vpop.permute.xlu2 %230  ;;  %v2079_v41 = vpop.permute.xlu0 %208 }
 0x109   :  { %v2081_v42 = vpop.permute.xlu1 %210 }
 0x110   :  { %v2083_v43 = vpop.permute.xlu2 %368  ;;  %v2085_v44 = vpop.permute.xlu0 %214 }
 0x111   :  { %v2087_v45 = vpop.permute.xlu1 %216 }
 0x118   :  { %v2089_v46 = vpop.permute.xlu2 %374  ;;  %v2091_v47 = vpop.permute.xlu0 %220 }
 0x119   :  { %v2093_v48 = vpop.permute.xlu1 %222 }
 0x120   :  { %v2095_v49 = vpop.permute.xlu2 %380  ;;  %v2097_v50 = vpop.permute.xlu0 %226 }
 0x121   :  { %v2099_v51 = vpop.permute.xlu1 %228 }
 0x128   :  { %v2101_v52 = vpop.permute.xlu2 %386  ;;  %v2103_v53 = vpop.permute.xlu0 %232 }
 0x129   :  { %2875 = vst [vmem:[#allocation10_spill] sm:$0xff] %v2103_v53  ;;  %v2105_v54 = vpop.permute.xlu1 %234 }
 0x130   :  { %v2107_v55 = vpop.permute.xlu2 %392  ;;  %v2109_v56 = vpop.permute.xlu0 %370 }
 0x131   :  { %v2111_v57 = vpop.permute.xlu1 %366 }
 0x138   :  { %v466_v58 = vpop.permute.xlu2 %465  ;;  %v2113_v59 = vpop.permute.xlu0 %376 }
 0x139   :  { %v2115_v60 = vpop.permute.xlu1 %372  ;;  %v496_v61 = vmul.f32 0.0, %v466_v58  ;;  %v497_v62 = vmul.f32 %v466_v58, %v1981_v27 }
 0x13b   :  { %528 = vrot.lane.b32.xlu1 %v496_v61, %s1870_s5  ;;  %530 = vrot.lane.b32.xlu2 %v497_v62, %s1870_s5  ;;  %v1778_v61 = vld [vmem:[%s2870_s1 + $0x21] ss:$0 sm:$0xff]  ;;  %v1780_v62 = vld [vmem:[%s2870_s1 + $0x20] ss:$0 sm:$0xff] }
 0x140   :  { %v2120_v63 = vpop.permute.xlu0 %382  ;;  %v478_v9 = vpop.permute.xlu2 %477 }
 0x141   :  { %v2122_v0 = vpop.permute.xlu1 %378  ;;  %v502_v13 = vmul.f32 0.0, %v478_v9  ;;  %v503_v15 = vmul.f32 %v478_v9, %v1981_v27  ;;  %v1782_v9 = vld [vmem:[%s2870_s1 + $0x25] ss:$0 sm:$0xff] }
 0x148   :  { %v2124_v1 = vpop.permute.xlu0 %388  ;;  %v490_v19 = vpop.permute.xlu2 %489 }
 0x149   :  { %v2126_v2 = vpop.permute.xlu1 %384  ;;  %v508_v23 = vmul.f32 0.0, %v490_v19  ;;  %v509_v29 = vmul.f32 %v490_v19, %v1981_v27 }
 0x150   :  { %v2128_v3 = vpop.permute.xlu0 %394 }
 0x151   :  { %2876 = vst [vmem:[#allocation11_spill] sm:$0xff] %v2128_v3  ;;  %v2130_v4 = vpop.permute.xlu1 %390 }
 0x158   :  { %v470_v5 = vpop.permute.xlu0 %469 }
 0x159   :  { %v2132_v6 = vpop.permute.xlu1 %396  ;;  %v498_v7 = vmul.f32 0.0, %v470_v5  ;;  %v499_v8 = vmul.f32 %v470_v5, %v1981_v27  ;;  %v1779_v5 = vld [vmem:[%s2870_s1 + $0x22] ss:$0 sm:$0xff] }
 0x15a   :  { %2877 = vst [vmem:[#allocation12_spill] sm:$0xff] %v2132_v6 }
 0x15b   :  { %532 = vrot.lane.b32.xlu0 %v498_v7, %s1870_s5  ;;  %534 = vrot.lane.b32.xlu1 %v499_v8, %s1870_s5  ;;  %v1781_v7 = vld [vmem:[%s2870_s1 + $0x24] ss:$0 sm:$0xff]  ;;  %v1783_v8 = vld [vmem:[%s2870_s1 + $0x23] ss:$0 sm:$0xff] }
 0x160   :  { %v482_v14 = vpop.permute.xlu0 %481 }
 0x161   :  { %v474_v10 = vpop.permute.xlu1 %473  ;;  %v504_v16 = vmul.f32 0.0, %v482_v14  ;;  %v505_v17 = vmul.f32 %v482_v14, %v1981_v27 }
 0x162   :  { %v500_v11 = vmul.f32 0.0, %v474_v10  ;;  %v501_v12 = vmul.f32 %v474_v10, %v1981_v27  ;;  %v1784_v10 = vld [vmem:[%s2870_s1 + $0x27] ss:$0 sm:$0xff] }
 0x163   :  { %540 = vrot.lane.b32.xlu1 %v502_v13, %s1870_s5 }
 0x164   :  { %538 = vrot.lane.b32.xlu0 %v501_v12, %s1870_s5  ;;  %536 = vrot.lane.b32.xlu2 %v500_v11, %s1870_s5  ;;  %v1785_v11 = vld [vmem:[%s2870_s1 + $0x26] ss:$0 sm:$0xff]  ;;  %s1871_s1 = smov 124  }
 0x168   :  { %v494_v24 = vpop.permute.xlu0 %493 }
 0x169   :  { %v486_v18 = vpop.permute.xlu1 %485  ;;  %v510_v30 = vmul.f32 0.0, %v494_v24  ;;  %v511_v58 = vmul.f32 %v494_v24, %v1981_v27 }
 0x16a   :  { %v506_v20 = vmul.f32 0.0, %v486_v18  ;;  %v507_v22 = vmul.f32 %v486_v18, %v1981_v27 }
 0x16b   :  { %546 = vrot.lane.b32.xlu1 %v505_v17, %s1870_s5 }
 0x16c   :  { %544 = vrot.lane.b32.xlu0 %v504_v16, %s1870_s5  ;;  %542 = vrot.lane.b32.xlu2 %v503_v15, %s1870_s5 }
 0x173   :  { %552 = vrot.lane.b32.xlu1 %v508_v23, %s1870_s5 }
 0x174   :  { %550 = vrot.lane.b32.xlu0 %v507_v22, %s1870_s5  ;;  %548 = vrot.lane.b32.xlu2 %v506_v20, %s1870_s5 }
 0x17b   :  { %558 = vrot.lane.b32.xlu1 %v511_v58, %s1870_s5 }
 0x17c   :  { %556 = vrot.lane.b32.xlu0 %v510_v30, %s1870_s5  ;;  %554 = vrot.lane.b32.xlu2 %v509_v29, %s1870_s5 }
 0x183   :  { %635 = vperm.xlu1 %1744, %v1779_v5  }
 0x184   :  { %631 = vperm.xlu0 %1743, %v1778_v61   ;;  %627 = vperm.xlu2 %1745, %v1780_v62  }
 0x18b   :  { %647 = vperm.xlu1 %1744, %v1782_v9  }
 0x18c   :  { %643 = vperm.xlu0 %1743, %v1781_v7   ;;  %639 = vperm.xlu2 %1745, %v1783_v8  }
 0x194   :  { %655 = vperm.xlu0 %1743, %v1784_v10   ;;  %651 = vperm.xlu2 %1745, %v1785_v11  }
 0x195   :  { %v2179_v12 = vpop.permute.xlu2 %530 }
 0x1ad   :  { %v2183_v14 = vpop.permute.xlu1 %528 }
 0x1be   :  { %v2181_v13 = vpop.permute.xlu2 %536 }
 0x1c6   :  { %v2185_v15 = vpop.permute.xlu2 %542 }
 0x1cd   :  { %v2187_v16 = vpop.permute.xlu0 %532  ;;  %v2189_v17 = vpop.permute.xlu1 %534 }
 0x1ce   :  { %v2191_v18 = vpop.permute.xlu2 %548 }
 0x1d5   :  { %v2195_v20 = vpop.permute.xlu1 %540 }
 0x1d6   :  { %v2193_v19 = vpop.permute.xlu0 %538  ;;  %v2197_v22 = vpop.permute.xlu2 %554 }
 0x1dd   :  { %v2201_v24 = vpop.permute.xlu1 %546 }
 0x1de   :  { %v2199_v23 = vpop.permute.xlu0 %544  ;;  %v628_v29 = vpop.permute.xlu2 %627 }
 0x1df   :  { %v658_v30 = vmul.f32 0.0, %v628_v29  ;;  %v659_v58 = vmul.f32 %v628_v29, %v1981_v27 }
 0x1e1   :  { %690 = vrot.lane.b32.xlu1 %v658_v30, %s1871_s1  ;;  %692 = vrot.lane.b32.xlu2 %v659_v58, %s1871_s1 }
 0x1e5   :  { %v2208_v62 = vpop.permute.xlu1 %552 }
 0x1e6   :  { %v2206_v61 = vpop.permute.xlu0 %550  ;;  %v640_v58 = vpop.permute.xlu2 %639 }
 0x1e7   :  { %v664_v3 = vmul.f32 0.0, %v640_v58  ;;  %v665_v53 = vmul.f32 %v640_v58, %v1981_v27 }
 0x1ed   :  { %v2210_v7 = vpop.permute.xlu1 %558 }
 0x1ee   :  { %v557_v5 = vpop.permute.xlu0 %556 }
 0x1ef   :  { %v2214_v8 = vsel %vm560_vm0, %v557_v5, %v2210_v7 }
 0x1f0   :  { %2878 = vst [vmem:[#allocation13_spill] sm:$0xff] %v2214_v8 }
 0x1f5   :  { %v636_v29 = vpop.permute.xlu1 %635 }
 0x1f6   :  { %v632_v9 = vpop.permute.xlu0 %631  ;;  %v662_v30 = vmul.f32 0.0, %v636_v29  ;;  %v663_v6 = vmul.f32 %v636_v29, %v1981_v27  ;;  %v652_v29 = vpop.permute.xlu2 %651 }
 0x1f7   :  { %v660_v10 = vmul.f32 0.0, %v632_v9  ;;  %v661_v11 = vmul.f32 %v632_v9, %v1981_v27 }
 0x1f8   :  { %698 = vrot.lane.b32.xlu2 %v662_v30, %s1871_s1  ;;  %v670_v30 = vmul.f32 0.0, %v652_v29 }
 0x1f9   :  { %694 = vrot.lane.b32.xlu0 %v660_v10, %s1871_s1  ;;  %696 = vrot.lane.b32.xlu1 %v661_v11, %s1871_s1 }
 0x1fd   :  { %v648_v9 = vpop.permute.xlu1 %647 }
 0x1fe   :  { %v644_v5 = vpop.permute.xlu0 %643  ;;  %v668_v11 = vmul.f32 0.0, %v648_v9 }
 0x1ff   :  { %v666_v8 = vmul.f32 0.0, %v644_v5  ;;  %v667_v10 = vmul.f32 %v644_v5, %v1981_v27  ;;  %v100_v5 = vmul.f32 %v1988_v32, %v1981_v27 }
 0x200   :  { %704 = vrot.lane.b32.xlu2 %v665_v53, %s1871_s1 }
 0x201   :  { %700 = vrot.lane.b32.xlu0 %v663_v6, %s1871_s1  ;;  %702 = vrot.lane.b32.xlu1 %v664_v3, %s1871_s1  ;;  %v669_v6 = vmul.f32 %v648_v9, %v1981_v27  ;;  %v671_v3 = vmul.f32 %v652_v29, %v1981_v27  ;;  %v262_v9 = vadd.f32 %v2052_v21, %v100_v5 }
 0x206   :  { %v656_v53 = vpop.permute.xlu0 %655 }
 0x207   :  { %v672_v58 = vmul.f32 0.0, %v656_v53 }
 0x208   :  { %710 = vrot.lane.b32.xlu2 %v668_v11, %s1871_s1 }
 0x209   :  { %706 = vrot.lane.b32.xlu0 %v666_v8, %s1871_s1  ;;  %708 = vrot.lane.b32.xlu1 %v667_v10, %s1871_s1  ;;  %v673_v8 = vmul.f32 %v656_v53, %v1981_v27  ;;  %v424_v10 = vadd.f32 %v2083_v43, %v262_v9  ;;  %v399_v53 = vsel %vm398_vm2, %v2111_v57, %v2083_v43  ;;  %v101_v43 = vmul.f32 0.0, %v1992_v34 }
 0x20b   :  { %v586_v11 = vadd.f32 %v2179_v12, %v424_v10 }
 0x210   :  { %716 = vrot.lane.b32.xlu2 %v671_v3, %s1871_s1  ;;  %v99_v3 = vmul.f32 0.0, %v1988_v32  ;;  %v102_v32 = vmul.f32 %v1992_v34, %v1981_v27 }
 0x211   :  { %712 = vrot.lane.b32.xlu0 %v669_v6, %s1871_s1  ;;  %714 = vrot.lane.b32.xlu1 %v670_v30, %s1871_s1  ;;  %v237_v6 = vsel %vm236_vm1, %v2075_v39, %v2052_v21  ;;  %v238_v21 = vsel %vm236_vm1, %v2079_v41, %v2081_v42  ;;  %v104_v41 = vmul.f32 %v1986_v31, %v1981_v27 }
 0x212   :  { %v264_v57 = vadd.f32 %v2081_v42, %v102_v32 }
 0x219   :  { %718 = vrot.lane.b32.xlu0 %v672_v58, %s1871_s1  ;;  %720 = vrot.lane.b32.xlu1 %v673_v8, %s1871_s1  ;;  %v261_v58 = vadd.f32 %v237_v6, %v99_v3  ;;  %v561_v8 = vsel %vm560_vm0, %v2183_v14, %v2179_v12  ;;  %v400_v12 = vsel %vm398_vm2, %v2109_v56, %v2115_v60 }
 0x21a   :  { %v263_v14 = vadd.f32 %v238_v21, %v101_v43  ;;  %v562_v6 = vsel %vm560_vm0, %v2187_v16, %v2189_v17  ;;  %v239_v56 = vsel %vm236_vm1, %v2063_v28, %v2085_v44  ;;  %v402_v28 = vsel %vm398_vm2, %v2122_v0, %v2095_v49 }
 0x21b   :  { %v423_v5 = vadd.f32 %v399_v53, %v261_v58 }
 0x21c   :  { %v425_v3 = vadd.f32 %v400_v12, %v263_v14 }
 0x21d   :  { %v585_v9 = vadd.f32 %v561_v8, %v423_v5  ;;  %v103_v5 = vmul.f32 0.0, %v1986_v31 }
 0x21e   :  { %v587_v34 = vadd.f32 %v562_v6, %v425_v3 }
 0x23b   :  { %v693_v29 = vpop.permute.xlu2 %692 }
 0x23c   :  { %v748_v30 = vadd.f32 %v693_v29, %v586_v11 }
 0x23e   :  { %799 = vrot.lane.b32.xlu0 %v748_v30, %s1872_s0 }
 0x252   :  { %v699_v39 = vpop.permute.xlu2 %698 }
 0x253   :  { %v691_v10 = vpop.permute.xlu1 %690 }
 0x254   :  { %v723_v11 = vsel %vm722_vm3, %v691_v10, %v693_v29  ;;  %v426_v29 = vadd.f32 %v2115_v60, %v264_v57  ;;  %v240_v60 = vsel %vm236_vm1, %v2087_v45, %v2071_v37  ;;  %v266_v10 = vadd.f32 %v2085_v44, %v104_v41 }
 0x255   :  { %v747_v30 = vadd.f32 %v723_v11, %v585_v9  ;;  %v401_v11 = vsel %vm398_vm2, %v2089_v46, %v2113_v59  ;;  %v265_v45 = vadd.f32 %v239_v56, %v103_v5  ;;  %v563_v44 = vsel %vm560_vm0, %v2181_v13, %v2193_v19 }
 0x256   :  { %v588_v53 = vadd.f32 %v2189_v17, %v426_v29  ;;  %v105_v17 = vmul.f32 0.0, %v1990_v33  ;;  %v428_v31 = vadd.f32 %v2113_v59, %v266_v10  ;;  %v564_v46 = vsel %vm560_vm0, %v2195_v20, %v2185_v15 }
 0x257   :  { %797 = vrot.lane.b32.xlu2 %v747_v30, %s1872_s0  ;;  %v427_v21 = vadd.f32 %v401_v11, %v265_v45  ;;  %v108_v57 = vmul.f32 %v1974_v25, %v1981_v27  ;;  %v241_v59 = vsel %vm236_vm1, %v2091_v47, %v2093_v48  ;;  %v111_v10 = vmul.f32 0.0, %v1996_v36 }
 0x258   :  { %v267_v32 = vadd.f32 %v240_v60, %v105_v17  ;;  %v590_v0 = vadd.f32 %v2193_v19, %v428_v31 }
 0x259   :  { %v589_v12 = vadd.f32 %v563_v44, %v427_v21 }
 0x25a   :  { %v705_v30 = vpop.permute.xlu2 %704  ;;  %v429_v43 = vadd.f32 %v402_v28, %v267_v32 }
 0x25c   :  { %v591_v14 = vadd.f32 %v564_v46, %v429_v43  ;;  %v114_v46 = vmul.f32 %v1994_v35, %v1981_v27 }
 0x26b   :  { %v695_v58 = vpop.permute.xlu0 %694  ;;  %v697_v42 = vpop.permute.xlu1 %696 }
 0x26c   :  { %v724_v8 = vsel %vm722_vm3, %v695_v58, %v697_v42  ;;  %v750_v16 = vadd.f32 %v697_v42, %v588_v53  ;;  %v107_v53 = vmul.f32 0.0, %v1974_v25  ;;  %v270_v58 = vadd.f32 %v2093_v48, %v108_v57 }
 0x26d   :  { %v749_v9 = vadd.f32 %v724_v8, %v587_v34  ;;  %v106_v34 = vmul.f32 %v1990_v33, %v1981_v27  ;;  %v403_v42 = vsel %vm398_vm2, %v2120_v63, %v2126_v2  ;;  %v711_v33 = vpop.permute.xlu2 %710  ;;  %v110_v8 = vmul.f32 %v1976_v26, %v1981_v27 }
 0x26e   :  { %803 = vrot.lane.b32.xlu2 %v750_v16, %s1872_s0  ;;  %v269_v56 = vadd.f32 %v241_v59, %v107_v53  ;;  %v432_v25 = vadd.f32 %v2126_v2, %v270_v58  ;;  %v112_v59 = vmul.f32 %v1996_v36, %v1981_v27 }
 0x26f   :  { %801 = vrot.lane.b32.xlu1 %v749_v9, %s1872_s0  ;;  %v268_v47 = vadd.f32 %v2071_v37, %v106_v34  ;;  %v242_v37 = vsel %vm236_vm1, %v2073_v38, %v2097_v50  ;;  %v272_v28 = vadd.f32 %v2097_v50, %v110_v8  ;;  %v404_v38 = vsel %vm398_vm2, %v2101_v52, %v2124_v1 }
 0x270   :  { %v431_v48 = vadd.f32 %v403_v42, %v269_v56  ;;  %v594_v63 = vadd.f32 %v2201_v24, %v432_v25  ;;  %v566_v50 = vsel %vm560_vm0, %v2191_v18, %v2206_v61  ;;  %v567_v52 = vsel %vm560_vm0, %v2208_v62, %v2197_v22  ;;  %v2879_v18 = vld [vmem:[#allocation10_spill] sm:$0xff] }
 0x271   :  { %v430_v60 = vadd.f32 %v2095_v49, %v268_v47  ;;  %v244_v57 = vsel %vm236_vm1, %v2879_v18, %v2105_v54  ;;  %v763_v8 = vlaneseq }
 0x273   :  { %v701_v29 = vpop.permute.xlu0 %700  ;;  %v703_v6 = vpop.permute.xlu1 %702  ;;  %v592_v17 = vadd.f32 %v2185_v15, %v430_v60  ;;  %v1790_v60 = vld [vmem:[%s2871_s2 + $0x5] ss:$0 sm:$0xff] }
 0x274   :  { %v725_v13 = vsel %vm722_vm3, %v699_v39, %v701_v29  ;;  %v752_v3 = vadd.f32 %v701_v29, %v590_v0  ;;  %v726_v20 = vsel %vm722_vm3, %v703_v6, %v705_v30  ;;  %v565_v39 = vsel %vm560_vm0, %v2199_v23, %v2201_v24 }
 0x275   :  { %v751_v41 = vadd.f32 %v725_v13, %v589_v12  ;;  %v753_v19 = vadd.f32 %v726_v20, %v591_v14  ;;  %v593_v2 = vadd.f32 %v565_v39, %v431_v48  ;;  %v243_v23 = vsel %vm236_vm1, %v2099_v51, %v2077_v40  ;;  %v717_v44 = vpop.permute.xlu2 %716  ;;  %v2881_v20 = vld [vmem:[#allocation11_spill] sm:$0xff]  ;;  %v1789_v48 = vld [vmem:[%s2871_s2 + $0x4] ss:$0 sm:$0xff] }
 0x276   :  { %v109_v24 = vmul.f32 0.0, %v1976_v26  ;;  %v405_v51 = vsel %vm398_vm2, %v2130_v4, %v2107_v55  ;;  %v754_v45 = vadd.f32 %v705_v30, %v592_v17  ;;  %v273_v32 = vadd.f32 %v243_v23, %v111_v10  ;;  %v1795_v17 = vld [vmem:[%s2871_s2 + $0xa] ss:$0 sm:$0xff] }
 0x277   :  { %807 = vrot.lane.b32.xlu1 %v752_v3, %s1872_s0  ;;  %809 = vrot.lane.b32.xlu2 %v753_v19, %s1872_s0  ;;  %v434_v26 = vadd.f32 %v2124_v1, %v272_v28  ;;  %v113_v29 = vmul.f32 0.0, %v1994_v35  ;;  %v276_v13 = vadd.f32 %v2105_v54, %v114_v46  ;;  %v2880_v3 = vld [vmem:[#allocation12_spill] sm:$0xff]  ;;  %v274_v19 = vadd.f32 %v2077_v40, %v112_v59  ;;  %v2882_v54 = vld [vmem:[#allocation13_spill] sm:$0xff] }
 0x278   :  { %805 = vrot.lane.b32.xlu0 %v751_v41, %s1872_s0  ;;  %v271_v15 = vadd.f32 %v242_v37, %v109_v24  ;;  %v435_v30 = vadd.f32 %v405_v51, %v273_v32  ;;  %v406_v53 = vsel %vm398_vm2, %v2881_v20, %v2880_v3  ;;  %v1792_v37 = vld [vmem:[%s2871_s2 + $0x7] ss:$0 sm:$0xff]  ;;  %v2423_v28 = vstv %s1670_s17  ;;  %v1798_v51 = vld [vmem:[%s2871_s2 + $0xd] ss:$0 sm:$0xff] }
 0x279   :  { %v596_v31 = vadd.f32 %v2206_v61, %v434_v26  ;;  %v275_v41 = vadd.f32 %v244_v57, %v113_v29  ;;  %v438_v35 = vadd.f32 %v2880_v3, %v276_v13  ;;  %v436_v27 = vadd.f32 %v2107_v55, %v274_v19  ;;  %v1786_v55 = vld [vmem:[%s2871_s2 + $0x1] ss:$0 sm:$0xff]  ;;  %v1800_v26 = vld [vmem:[%s2871_s2 + $0xc] ss:$0 sm:$0xff] }
 0x27a   :  { %v433_v4 = vadd.f32 %v404_v38, %v271_v15  ;;  %v597_v1 = vadd.f32 %v567_v52, %v435_v30  ;;  %v2434_v32 = vstv %s1669_s23 }
 0x27b   :  { %v707_v16 = vpop.permute.xlu0 %706  ;;  %v709_v5 = vpop.permute.xlu1 %708  ;;  %v437_v34 = vadd.f32 %v406_v53, %v275_v41  ;;  %v600_v36 = vadd.f32 %v2210_v7, %v438_v35  ;;  %v598_v47 = vadd.f32 %v2197_v22, %v436_v27  ;;  %v1787_v7 = vld [vmem:[%s2871_s2 + $0x2] ss:$0 sm:$0xff]  ;;  %v1788_v22 = vld [vmem:[%s2871_s2] ss:$0 sm:$0xff] }
 0x27c   :  { %v727_v49 = vsel %vm722_vm3, %v707_v16, %v709_v5  ;;  %v756_v9 = vadd.f32 %v709_v5, %v594_v63  ;;  %v595_v21 = vadd.f32 %v566_v50, %v433_v4  ;;  %v1791_v63 = vld [vmem:[%s2871_s2 + $0x3] ss:$0 sm:$0xff]  ;;  %v1794_v16 = vld [vmem:[%s2871_s2 + $0x6] ss:$0 sm:$0xff]  ;;  %v764_v5 = vand.u32 127, %v763_v8 }
 0x27d   :  { %v755_v11 = vadd.f32 %v727_v49, %v593_v2  ;;  %v599_v58 = vadd.f32 %v2882_v54, %v437_v34  ;;  %v760_v40 = vadd.f32 %v717_v44, %v598_v47  ;;  %v1793_v2 = vld [vmem:[%s2871_s2 + $0x8] ss:$0 sm:$0xff]  ;;  %v1796_v49 = vld [vmem:[%s2871_s2 + $0xb] ss:$0 sm:$0xff]  ;;  %v2441_v4 = vstv %s31_s24 }
 0x27e   :  { %v2406_v23 = vadd.s32 4294967288, %v764_v5 }
 0x27f   :  { %813 = vrot.lane.b32.xlu1 %v755_v11, %s1872_s0  ;;  %815 = vrot.lane.b32.xlu2 %v756_v9, %s1872_s0  ;;  %v1797_v9 = vld [vmem:[%s2871_s2 + $0x9] ss:$0 sm:$0xff] }
 0x280   :  { %811 = vrot.lane.b32.xlu0 %v754_v45, %s1872_s0  ;;  %vm771_vm4 = vcmp.ge.s32.totalorder %v2406_v23, 2  ;;  %vm773_vm5 = vcmp.lt.s32.totalorder %v2406_v23, 18  ;;  %v1799_v45 = vld [vmem:[%s2871_s2 + $0xe] ss:$0 sm:$0xff]  ;;  %vm1645_vm9 = vcmp.ge.s32.totalorder %v2406_v23, 0  ;;  %vm1646_vm10 = vcmp.lt.s32.totalorder %v2406_v23, 16 }
 0x281   :  { %vm2419_vm7 = vmand %vm771_vm4, %vm773_vm5 }
 0x282   :  { %vm1647_vm11 = vmand %vm1645_vm9, %vm1646_vm10 }
 0x283   :  { %v713_v43 = vpop.permute.xlu0 %712  ;;  %v715_v0 = vpop.permute.xlu1 %714 }
 0x284   :  { %v728_v62 = vsel %vm722_vm3, %v711_v33, %v713_v43  ;;  %v758_v12 = vadd.f32 %v713_v43, %v596_v31  ;;  %v729_v14 = vsel %vm722_vm3, %v715_v0, %v717_v44  ;;  %v1801_v44 = vld [vmem:[%s2871_s2 + $0xf] ss:$0 sm:$0xff] }
 0x285   :  { %v757_v61 = vadd.f32 %v728_v62, %v595_v21  ;;  %v759_v6 = vadd.f32 %v729_v14, %v597_v1  ;;  %v872_v21 = vmul.f32 0.0, %v2423_v28 }
 0x287   :  { %819 = vrot.lane.b32.xlu1 %v758_v12, %s1872_s0  ;;  %821 = vrot.lane.b32.xlu2 %v759_v6, %s1872_s0  ;;  %v889_v43 = vadd.f32 %v2434_v32, %v872_v21 }
 0x288   :  { %817 = vrot.lane.b32.xlu0 %v757_v61, %s1872_s0 }
 0x289   :  { %v905_v0 = vmul.f32 0.0, %v889_v43 }
 0x28b   :  { %v719_v42 = vpop.permute.xlu0 %718  ;;  %v721_v56 = vpop.permute.xlu1 %720  ;;  %v922_v57 = vadd.f32 %v2441_v4, %v905_v0 }
 0x28c   :  { %v730_v25 = vsel %vm722_vm3, %v719_v42, %v721_v56  ;;  %v762_v39 = vadd.f32 %v721_v56, %v600_v36 }
 0x28d   :  { %v761_v33 = vadd.f32 %v730_v25, %v599_v58  ;;  %v938_v62 = vmul.f32 0.0, %v922_v57 }
 0x28f   :  { %825 = vrot.lane.b32.xlu1 %v761_v33, %s1872_s0  ;;  %827 = vrot.lane.b32.xlu2 %v762_v39, %s1872_s0  ;;  %955 = vst.msk [vmem:[#allocation3 + $0x8] sm:$0xff] %vm954_vm8, %v938_v62 }
 0x290   :  { %823 = vrot.lane.b32.xlu0 %v760_v40, %s1872_s0  ;;  %957 = vst.msk [vmem:[#allocation3 + $0x18] sm:$0xff] %vm954_vm8, %v938_v62 }
 0x291   :  { %959 = vst.msk [vmem:[#allocation3 + $0x28] sm:$0xff] %vm954_vm8, %v938_v62 }
 0x292   :  { %961 = vst.msk [vmem:[#allocation3 + $0x38] sm:$0xff] %vm954_vm8, %v938_v62 }
 0x293   :  { %963 = vst.msk [vmem:[#allocation3 + $0x48] sm:$0xff] %vm954_vm8, %v938_v62 }
 0x294   :  { %965 = vst.msk [vmem:[#allocation3 + $0x58] sm:$0xff] %vm954_vm8, %v938_v62 }
 0x295   :  { %967 = vst.msk [vmem:[#allocation3 + $0x68] sm:$0xff] %vm954_vm8, %v938_v62 }
 0x296   :  { %969 = vst.msk [vmem:[#allocation3 + $0x78] sm:$0xff] %vm954_vm8, %v938_v62 }
 0x297   :  { %1007 = vperm.xlu1 %1744, %v1786_v55   ;;  %1011 = vperm.xlu2 %1745, %v1787_v7  }
 0x298   :  { %1003 = vperm.xlu0 %1743, %v1788_v22  }
 0x29f   :  { %1019 = vperm.xlu1 %1744, %v1789_v48   ;;  %1023 = vperm.xlu2 %1745, %v1790_v60  }
 0x2a0   :  { %1015 = vperm.xlu0 %1743, %v1791_v63  }
 0x2a7   :  { %1031 = vperm.xlu1 %1744, %v1792_v37   ;;  %1084 = vperm.xlu2 %1745, %v1793_v2  }
 0x2a8   :  { %1027 = vperm.xlu0 %1743, %v1794_v16  }
 0x2af   :  { %1092 = vperm.xlu1 %1744, %v1795_v17   ;;  %1096 = vperm.xlu2 %1745, %v1796_v49  }
 0x2b0   :  { %1088 = vperm.xlu0 %1743, %v1797_v9   ;;  %v800_v24 = vpop.permute.xlu0 %799 }
 0x2b1   :  { %v798_v11 = vpop.permute.xlu2 %797 }
 0x2b2   :  { %v830_v38 = vsel %vm829_vm6, %v798_v11, %v800_v24 }
 0x2b3   :  { %v854_v15 = vsel %vm2419_vm7, %v830_v38, 0.0 }
 0x2b4   :  { %v871_v50 = vmul.f32 %v2423_v28, %v854_v15 }
 0x2b6   :  { %v888_v52 = vadd.f32 %v2434_v32, %v871_v50 }
 0x2b7   :  { %1104 = vperm.xlu1 %1744, %v1798_v51   ;;  %1108 = vperm.xlu2 %1745, %v1799_v45  }
 0x2b8   :  { %1100 = vperm.xlu0 %1743, %v1800_v26   ;;  %v904_v30 = vmul.f32 %v888_v52, %v854_v15 }
 0x2ba   :  { %v921_v31 = vadd.f32 %v2441_v4, %v904_v30 }
 0x2bc   :  { %v2447_v46 = vmul.f32 %v921_v31, %v854_v15  ;;  %v2493_v15 = vld [vmem:[#allocation3 + $0x8] sm:$0xff] }
 0x2c0   :  { %1112 = vperm.xlu0 %1743, %v1801_v44  }
 0x2c8   :  { %v804_v1 = vpop.permute.xlu2 %803 }
 0x2d1   :  { %v810_v18 = vpop.permute.xlu2 %809 }
 0x2d9   :  { %v816_v12 = vpop.permute.xlu2 %815 }
 0x2e1   :  { %v802_v14 = vpop.permute.xlu1 %801  ;;  %v822_v29 = vpop.permute.xlu2 %821 }
 0x2e2   :  { %v831_v61 = vsel %vm829_vm6, %v802_v14, %v804_v1 }
 0x2e3   :  { %v856_v6 = vsel %vm2419_vm7, %v831_v61, 0.0  ;;  %v2510_v61 = vld [vmem:[#allocation3 + $0x38] sm:$0xff] }
 0x2e4   :  { %v873_v59 = vmul.f32 %v2423_v28, %v856_v6 }
 0x2e6   :  { %v890_v13 = vadd.f32 %v2434_v32, %v873_v59 }
 0x2e8   :  { %v906_v3 = vmul.f32 %v890_v13, %v856_v6 }
 0x2e9   :  { %v808_v20 = vpop.permute.xlu1 %807  ;;  %v828_v53 = vpop.permute.xlu2 %827 }
 0x2ea   :  { %v923_v41 = vadd.f32 %v2441_v4, %v906_v3  ;;  %v806_v19 = vpop.permute.xlu0 %805 }
 0x2eb   :  { %v832_v35 = vsel %vm829_vm6, %v806_v19, %v808_v20 }
 0x2ec   :  { %v2459_v34 = vmul.f32 %v923_v41, %v856_v6  ;;  %v858_v27 = vsel %vm2419_vm7, %v832_v35, 0.0 }
 0x2ed   :  { %v875_v36 = vmul.f32 %v2423_v28, %v858_v27 }
 0x2ef   :  { %v892_v54 = vadd.f32 %v2434_v32, %v875_v36  ;;  %v2532_v36 = vld [vmem:[#allocation3 + $0x28] sm:$0xff] }
 0x2f1   :  { %v908_v58 = vmul.f32 %v892_v54, %v858_v27  ;;  %v814_v42 = vpop.permute.xlu1 %813  ;;  %v2465_v56 = vpop.permute.xlu2 %1011  ;;  %v2534_v54 = vld [vmem:[#allocation3 + $0x18] sm:$0xff] }
 0x2f2   :  { %v834_v47 = vsel %vm829_vm6, %v814_v42, %v816_v12  ;;  %v812_v25 = vpop.permute.xlu0 %811 }
 0x2f3   :  { %v925_v39 = vadd.f32 %v2441_v4, %v908_v58  ;;  %v862_v33 = vsel %vm2419_vm7, %v834_v47, 0.0  ;;  %v833_v40 = vsel %vm829_vm6, %v810_v18, %v812_v25 }
 0x2f4   :  { %v879_v55 = vmul.f32 %v2423_v28, %v862_v33  ;;  %v860_v7 = vsel %vm2419_vm7, %v833_v40, 0.0 }
 0x2f5   :  { %v2475_v22 = vmul.f32 %v925_v39, %v858_v27  ;;  %v877_v48 = vmul.f32 %v2423_v28, %v860_v7 }
 0x2f6   :  { %v896_v60 = vadd.f32 %v2434_v32, %v879_v55 }
 0x2f7   :  { %v894_v63 = vadd.f32 %v2434_v32, %v877_v48  ;;  %v2548_v48 = vld [vmem:[#allocation3 + $0x68] sm:$0xff] }
 0x2f8   :  { %v912_v8 = vmul.f32 %v896_v60, %v862_v33 }
 0x2f9   :  { %v910_v37 = vmul.f32 %v894_v63, %v860_v7  ;;  %v820_v2 = vpop.permute.xlu1 %819  ;;  %v2480_v16 = vpop.permute.xlu2 %1023 }
 0x2fa   :  { %v929_v5 = vadd.f32 %v2441_v4, %v912_v8  ;;  %v818_v17 = vpop.permute.xlu0 %817 }
 0x2fb   :  { %v927_v49 = vadd.f32 %v2441_v4, %v910_v37  ;;  %v835_v9 = vsel %vm829_vm6, %v818_v17, %v820_v2  ;;  %v2556_v2 = vld [vmem:[#allocation3 + $0x58] sm:$0xff]  ;;  %v1802_v17 = vld [vmem:[%s2871_s2 + $0x10] ss:$0 sm:$0xff] }
 0x2fc   :  { %v2485_v24 = vmul.f32 %v929_v5, %v862_v33  ;;  %v864_v11 = vsel %vm2419_vm7, %v835_v9, 0.0  ;;  %v2558_v5 = vld [vmem:[#allocation3 + $0x48] sm:$0xff] }
 0x2fd   :  { %v2489_v38 = vmul.f32 %v927_v49, %v860_v7  ;;  %v881_v51 = vmul.f32 %v2423_v28, %v864_v11 }
 0x2ff   :  { %v898_v45 = vadd.f32 %v2434_v32, %v881_v51  ;;  %v1803_v51 = vld [vmem:[%s2871_s2 + $0x13] ss:$0 sm:$0xff] }
 0x301   :  { %v914_v26 = vmul.f32 %v898_v45, %v864_v11  ;;  %v826_v50 = vpop.permute.xlu1 %825  ;;  %v1085_v52 = vpop.permute.xlu2 %1084 }
 0x302   :  { %v837_v30 = vsel %vm829_vm6, %v826_v50, %v828_v53  ;;  %v1116_v31 = vmul.f32 %v1085_v52, %v2493_v15  ;;  %v824_v44 = vpop.permute.xlu0 %823  ;;  %v1115_v55 = vmul.f32 %v1085_v52, %v2447_v46  ;;  %v2574_v50 = vld [vmem:[#allocation3 + $0x78] sm:$0xff]  ;;  %v1804_v52 = vld [vmem:[%s2871_s2 + $0x11] ss:$0 sm:$0xff] }
 0x303   :  { %v931_v21 = vadd.f32 %v2441_v4, %v914_v26  ;;  %v868_v1 = vsel %vm2419_vm7, %v837_v30, 0.0  ;;  %v836_v43 = vsel %vm829_vm6, %v822_v29, %v824_v44  ;;  %v1805_v30 = vld [vmem:[%s2871_s2 + $0x16] ss:$0 sm:$0xff]  ;;  %v1806_v44 = vld [vmem:[%s2871_s2 + $0x14] ss:$0 sm:$0xff] }
 0x304   :  { %v885_v0 = vmul.f32 %v2423_v28, %v868_v1  ;;  %v866_v18 = vsel %vm2419_vm7, %v836_v43, 0.0  ;;  %1149 = vrot.lane.b32.xlu2 %v1116_v31, %s1868_s15  ;;  %v1809_v43 = vld [vmem:[%s2871_s2 + $0x15] ss:$0 sm:$0xff] }
 0x305   :  { %v2505_v57 = vmul.f32 %v931_v21, %v864_v11  ;;  %v883_v62 = vmul.f32 %v2423_v28, %v866_v18  ;;  %v1807_v21 = vld [vmem:[%s2871_s2 + $0x12] ss:$0 sm:$0xff] }
 0x306   :  { %v902_v12 = vadd.f32 %v2434_v32, %v885_v0 }
 0x307   :  { %v900_v14 = vadd.f32 %v2434_v32, %v883_v62 }
 0x308   :  { %v918_v6 = vmul.f32 %v902_v12, %v868_v1 }
 0x309   :  { %v916_v59 = vmul.f32 %v900_v14, %v866_v18  ;;  %v2512_v29 = vpop.permute.xlu1 %1007  ;;  %v1097_v13 = vpop.permute.xlu2 %1096 }
 0x30a   :  { %v935_v10 = vadd.f32 %v2441_v4, %v918_v6  ;;  %v1122_v3 = vmul.f32 %v1097_v13, %v2510_v61  ;;  %v2516_v20 = vpop.permute.xlu0 %1003  ;;  %v1121_v37 = vmul.f32 %v1097_v13, %v2489_v38  ;;  %v1036_v6 = vmul.f32 %v2465_v56, %v2475_v22 }
 0x30b   :  { %v933_v53 = vadd.f32 %v2441_v4, %v916_v59  ;;  %v1034_v56 = vmul.f32 %v2516_v20, %v2447_v46  ;;  %v1039_v20 = vmul.f32 %v2480_v16, %v2505_v57 }
 0x30c   :  { %v2519_v28 = vmul.f32 %v935_v10, %v868_v1  ;;  %1161 = vrot.lane.b32.xlu2 %v1122_v3, %s1868_s15  ;;  %v1808_v1 = vld [vmem:[%s2871_s2 + $0x17] ss:$0 sm:$0xff] }
 0x30d   :  { %v2522_v32 = vmul.f32 %v933_v53, %v866_v18 }
 0x311   :  { %v2524_v41 = vpop.permute.xlu1 %1019  ;;  %v1109_v7 = vpop.permute.xlu2 %1108 }
 0x312   :  { %v2526_v19 = vpop.permute.xlu0 %1015  ;;  %v1128_v63 = vmul.f32 %v1109_v7, %v2548_v48  ;;  %v1127_v26 = vmul.f32 %v1109_v7, %v2522_v32 }
 0x319   :  { %v2528_v35 = vpop.permute.xlu1 %1031 }
 0x31a   :  { %v2530_v27 = vpop.permute.xlu0 %1027 }
 0x321   :  { %v1093_v58 = vpop.permute.xlu1 %1092 }
 0x322   :  { %v1119_v4 = vmul.f32 %v1093_v58, %v2475_v22  ;;  %v1120_v42 = vmul.f32 %v1093_v58, %v2532_v36  ;;  %v1089_v47 = vpop.permute.xlu0 %1088 }
 0x323   :  { %v1118_v25 = vmul.f32 %v1089_v47, %v2534_v54  ;;  %v1117_v33 = vmul.f32 %v1089_v47, %v2459_v34 }
 0x324   :  { %1157 = vrot.lane.b32.xlu0 %v1120_v42, %s1868_s15  ;;  %1155 = vrot.lane.b32.xlu2 %v1119_v4, %s1868_s15  ;;  %v1035_v42 = vmul.f32 %v2512_v29, %v2459_v34 }
 0x325   :  { %1153 = vrot.lane.b32.xlu1 %v1118_v25, %s1868_s15 }
 0x329   :  { %v1105_v39 = vpop.permute.xlu1 %1104 }
 0x32a   :  { %v1125_v40 = vmul.f32 %v1105_v39, %v2505_v57  ;;  %v1101_v60 = vpop.permute.xlu0 %1100  ;;  %v1126_v49 = vmul.f32 %v1105_v39, %v2556_v2 }
 0x32b   :  { %v1123_v8 = vmul.f32 %v1101_v60, %v2485_v24  ;;  %v1124_v9 = vmul.f32 %v1101_v60, %v2558_v5  ;;  %v1037_v60 = vmul.f32 %v2526_v19, %v2489_v38 }
 0x32c   :  { %1151 = vrot.lane.b32.xlu0 %v1117_v33, %s1868_s15  ;;  %1167 = vrot.lane.b32.xlu2 %v1125_v40, %s1868_s15 }
 0x32d   :  { %1147 = vrot.lane.b32.xlu1 %v1115_v55, %s1868_s15 }
 0x332   :  { %v1113_v11 = vpop.permute.xlu0 %1112 }
 0x333   :  { %v1129_v45 = vmul.f32 %v1113_v11, %v2519_v28  ;;  %v1130_v31 = vmul.f32 %v1113_v11, %v2574_v50 }
 0x334   :  { %1163 = vrot.lane.b32.xlu0 %v1123_v8, %s1868_s15  ;;  %1173 = vrot.lane.b32.xlu2 %v1128_v63, %s1868_s15 }
 0x335   :  { %1159 = vrot.lane.b32.xlu1 %v1121_v37, %s1868_s15 }
 0x33c   :  { %1169 = vrot.lane.b32.xlu0 %v1126_v49, %s1868_s15  ;;  %1229 = vperm.xlu2 %1745, %v1802_v17   ;;  %v1038_v17 = vmul.f32 %v2524_v41, %v2485_v24  ;;  %v1041_v41 = vmul.f32 %v2528_v35, %v2519_v28 }
 0x33d   :  { %1165 = vrot.lane.b32.xlu1 %v1124_v9, %s1868_s15 }
 0x344   :  { %1175 = vrot.lane.b32.xlu0 %v1129_v45, %s1868_s15  ;;  %1241 = vperm.xlu2 %1745, %v1803_v51  }
 0x345   :  { %1171 = vrot.lane.b32.xlu1 %v1127_v26, %s1868_s15  ;;  %v1040_v26 = vmul.f32 %v2530_v27, %v2522_v32 }
 0x34c   :  { %1233 = vperm.xlu0 %1743, %v1804_v52   ;;  %1253 = vperm.xlu2 %1745, %v1805_v30  }
 0x34d   :  { %1177 = vrot.lane.b32.xlu1 %v1130_v31, %s1868_s15 }
 0x354   :  { %1245 = vperm.xlu0 %1743, %v1806_v44  }
 0x355   :  { %1237 = vperm.xlu1 %1744, %v1807_v21  }
 0x35c   :  { %1257 = vperm.xlu0 %1743, %v1808_v1  }
 0x35d   :  { %1249 = vperm.xlu1 %1744, %v1809_v43  }
 0x35e   :  { %v1150_v0 = vpop.permute.xlu2 %1149 }
 0x366   :  { %v1162_v18 = vpop.permute.xlu2 %1161 }
 0x37e   :  { %v1156_v62 = vpop.permute.xlu2 %1155 }
 0x386   :  { %v1168_v12 = vpop.permute.xlu2 %1167 }
 0x38e   :  { %v1174_v14 = vpop.permute.xlu2 %1173 }
 0x396   :  { %v1158_v59 = vpop.permute.xlu0 %1157  ;;  %v1230_v13 = vpop.permute.xlu2 %1229 }
 0x397   :  { %v1181_v10 = vsel %vm236_vm1, %v1156_v62, %v1158_v59  ;;  %v1154_v3 = vpop.permute.xlu1 %1153  ;;  %v1260_v53 = vmul.f32 %v1230_v13, %v2447_v46  ;;  %v1261_v58 = vmul.f32 %v1230_v13, %v2493_v15 }
 0x398   :  { %v2601_v4 = vadd.f32 %v1181_v10, %v1036_v6 }
 0x399   :  { %1294 = vrot.lane.b32.xlu2 %v1261_v58, %s1869_s3  ;;  %1292 = vrot.lane.b32.xlu1 %v1260_v53, %s1869_s3 }
 0x39e   :  { %v1152_v47 = vpop.permute.xlu0 %1151  ;;  %v1242_v27 = vpop.permute.xlu2 %1241 }
 0x39f   :  { %v1180_v25 = vsel %vm236_vm1, %v1152_v47, %v1154_v3  ;;  %v1148_v39 = vpop.permute.xlu1 %1147  ;;  %v1267_v59 = vmul.f32 %v1242_v27, %v2510_v61 }
 0x3a0   :  { %v2610_v33 = vadd.f32 %v1180_v25, %v1035_v42  ;;  %v1179_v40 = vsel %vm236_vm1, %v1148_v39, %v1150_v0 }
 0x3a1   :  { %v2613_v55 = vadd.f32 %v1179_v40, %v1034_v56  ;;  %v1810_v40 = vld [vmem:[%s2871_s2 + $0x1a] ss:$0 sm:$0xff] }
 0x3a6   :  { %v1164_v7 = vpop.permute.xlu0 %1163  ;;  %v1254_v10 = vpop.permute.xlu2 %1253 }
 0x3a7   :  { %v1160_v63 = vpop.permute.xlu1 %1159  ;;  %v1272_v53 = vmul.f32 %v1254_v10, %v2522_v32  ;;  %v1273_v25 = vmul.f32 %v1254_v10, %v2548_v48 }
 0x3a8   :  { %v1182_v29 = vsel %vm236_vm1, %v1160_v63, %v1162_v18  ;;  %v1266_v18 = vmul.f32 %v1242_v27, %v2489_v38  ;;  %v1813_v63 = vld [vmem:[%s2871_s2 + $0x1d] ss:$0 sm:$0xff] }
 0x3a9   :  { %v2618_v8 = vadd.f32 %v1182_v29, %v1037_v60  ;;  %v1812_v60 = vld [vmem:[%s2871_s2 + $0x18] ss:$0 sm:$0xff]  ;;  %v1814_v29 = vld [vmem:[%s2871_s2 + $0x1c] ss:$0 sm:$0xff] }
 0x3ae   :  { %v1170_v37 = vpop.permute.xlu0 %1169 }
 0x3af   :  { %v1184_v49 = vsel %vm236_vm1, %v1168_v12, %v1170_v37  ;;  %v1166_v9 = vpop.permute.xlu1 %1165  ;;  %v1816_v37 = vld [vmem:[%s2871_s2 + $0x1f] ss:$0 sm:$0xff] }
 0x3b0   :  { %v2625_v11 = vadd.f32 %v1184_v49, %v1039_v20  ;;  %v1183_v51 = vsel %vm236_vm1, %v1164_v7, %v1166_v9  ;;  %v1811_v7 = vld [vmem:[%s2871_s2 + $0x19] ss:$0 sm:$0xff]  ;;  %v1815_v20 = vld [vmem:[%s2871_s2 + $0x1b] ss:$0 sm:$0xff] }
 0x3b1   :  { %v2628_v19 = vadd.f32 %v1183_v51, %v1038_v17  ;;  %v1817_v17 = vld [vmem:[%s2871_s2 + $0x1e] ss:$0 sm:$0xff] }
 0x3b6   :  { %v1176_v45 = vpop.permute.xlu0 %1175 }
 0x3b7   :  { %v1172_v52 = vpop.permute.xlu1 %1171 }
 0x3b8   :  { %v1185_v16 = vsel %vm236_vm1, %v1172_v52, %v1174_v14 }
 0x3b9   :  { %v2633_v30 = vadd.f32 %v1185_v16, %v1040_v26 }
 0x3be   :  { %v1234_v31 = vpop.permute.xlu0 %1233 }
 0x3bf   :  { %v1262_v44 = vmul.f32 %v1234_v31, %v2459_v34  ;;  %v1263_v21 = vmul.f32 %v1234_v31, %v2534_v54  ;;  %v1178_v1 = vpop.permute.xlu1 %1177 }
 0x3c0   :  { %v1186_v43 = vsel %vm236_vm1, %v1176_v45, %v1178_v1 }
 0x3c1   :  { %v2640_v0 = vadd.f32 %v1186_v43, %v1041_v41  ;;  %1296 = vrot.lane.b32.xlu0 %v1262_v44, %s1869_s3  ;;  %1298 = vrot.lane.b32.xlu1 %v1263_v21, %s1869_s3 }
 0x3c6   :  { %v1246_v14 = vpop.permute.xlu0 %1245 }
 0x3c7   :  { %v1238_v62 = vpop.permute.xlu1 %1237  ;;  %v1269_v6 = vmul.f32 %v1246_v14, %v2558_v5  ;;  %v1268_v13 = vmul.f32 %v1246_v14, %v2485_v24 }
 0x3c8   :  { %v1264_v12 = vmul.f32 %v1238_v62, %v2475_v22  ;;  %v1265_v35 = vmul.f32 %v1238_v62, %v2532_v36 }
 0x3c9   :  { %1304 = vrot.lane.b32.xlu1 %v1266_v18, %s1869_s3 }
 0x3ca   :  { %1302 = vrot.lane.b32.xlu0 %v1265_v35, %s1869_s3  ;;  %1300 = vrot.lane.b32.xlu2 %v1264_v12, %s1869_s3 }
 0x3ce   :  { %v1258_v47 = vpop.permute.xlu0 %1257 }
 0x3cf   :  { %v1250_v3 = vpop.permute.xlu1 %1249  ;;  %v1275_v56 = vmul.f32 %v1258_v47, %v2574_v50  ;;  %v1274_v39 = vmul.f32 %v1258_v47, %v2519_v28 }
 0x3d0   :  { %v1270_v58 = vmul.f32 %v1250_v3, %v2505_v57  ;;  %v1271_v42 = vmul.f32 %v1250_v3, %v2556_v2 }
 0x3d1   :  { %1310 = vrot.lane.b32.xlu1 %v1269_v6, %s1869_s3 }
 0x3d2   :  { %1308 = vrot.lane.b32.xlu0 %v1268_v13, %s1869_s3  ;;  %1306 = vrot.lane.b32.xlu2 %v1267_v59, %s1869_s3 }
 0x3d9   :  { %1316 = vrot.lane.b32.xlu1 %v1272_v53, %s1869_s3 }
 0x3da   :  { %1314 = vrot.lane.b32.xlu0 %v1271_v42, %s1869_s3  ;;  %1312 = vrot.lane.b32.xlu2 %v1270_v58, %s1869_s3 }
 0x3e1   :  { %1322 = vrot.lane.b32.xlu1 %v1275_v56, %s1869_s3 }
 0x3e2   :  { %1320 = vrot.lane.b32.xlu0 %v1274_v39, %s1869_s3  ;;  %1318 = vrot.lane.b32.xlu2 %v1273_v25, %s1869_s3 }
 0x3e9   :  { %1382 = vperm.xlu1 %1744, %v1810_v40  }
 0x3ea   :  { %1378 = vperm.xlu0 %1743, %v1811_v7   ;;  %1374 = vperm.xlu2 %1745, %v1812_v60  }
 0x3f1   :  { %1394 = vperm.xlu1 %1744, %v1813_v63  }
 0x3f2   :  { %1390 = vperm.xlu0 %1743, %v1814_v29   ;;  %1386 = vperm.xlu2 %1745, %v1815_v20  }
 0x3f3   :  { %v1295_v49 = vpop.permute.xlu2 %1294 }
 0x3fa   :  { %1402 = vperm.xlu0 %1743, %v1816_v37   ;;  %1398 = vperm.xlu2 %1745, %v1817_v17  }
 0x40b   :  { %v1293_v9 = vpop.permute.xlu1 %1292 }
 0x40c   :  { %v1324_v51 = vsel %vm398_vm2, %v1293_v9, %v1295_v49 }
 0x40d   :  { %v2694_v45 = vadd.f32 %v1324_v51, %v2613_v55 }
 0x424   :  { %v1301_v26 = vpop.permute.xlu2 %1300 }
 0x42c   :  { %v1307_v52 = vpop.permute.xlu2 %1306 }
 0x433   :  { %v1297_v16 = vpop.permute.xlu0 %1296  ;;  %v1299_v31 = vpop.permute.xlu1 %1298 }
 0x434   :  { %v1313_v41 = vpop.permute.xlu2 %1312  ;;  %v1325_v44 = vsel %vm398_vm2, %v1297_v16, %v1299_v31 }
 0x435   :  { %v2698_v21 = vadd.f32 %v1325_v44, %v2610_v33  ;;  %v1818_v44 = vld [vmem:[%s2871_s2 + $0x20] ss:$0 sm:$0xff] }
 0x43b   :  { %v1305_v1 = vpop.permute.xlu1 %1304 }
 0x43c   :  { %v1303_v43 = vpop.permute.xlu0 %1302  ;;  %v1319_v27 = vpop.permute.xlu2 %1318  ;;  %v1327_v18 = vsel %vm398_vm2, %v1305_v1, %v1307_v52 }
 0x43d   :  { %v1326_v62 = vsel %vm398_vm2, %v1301_v26, %v1303_v43  ;;  %v2703_v55 = vadd.f32 %v1327_v18, %v2618_v8  ;;  %v1822_v43 = vld [vmem:[%s2871_s2 + $0x24] ss:$0 sm:$0xff]  ;;  %v1821_v18 = vld [vmem:[%s2871_s2 + $0x22] ss:$0 sm:$0xff] }
 0x43e   :  { %v2706_v12 = vadd.f32 %v1326_v62, %v2601_v4  ;;  %v1825_v62 = vld [vmem:[%s2871_s2 + $0x27] ss:$0 sm:$0xff] }
 0x443   :  { %v1311_v35 = vpop.permute.xlu1 %1310 }
 0x444   :  { %v1309_v14 = vpop.permute.xlu0 %1308  ;;  %v1375_v6 = vpop.permute.xlu2 %1374 }
 0x445   :  { %v1405_v59 = vmul.f32 %v1375_v6, %v2447_v46  ;;  %v1406_v33 = vmul.f32 %v1375_v6, %v2493_v15  ;;  %v1328_v13 = vsel %vm398_vm2, %v1309_v14, %v1311_v35  ;;  %v1823_v35 = vld [vmem:[%s2871_s2 + $0x26] ss:$0 sm:$0xff]  ;;  %v1824_v14 = vld [vmem:[%s2871_s2 + $0x25] ss:$0 sm:$0xff] }
 0x446   :  { %v2712_v10 = vadd.f32 %v1328_v13, %v2628_v19 }
 0x447   :  { %1439 = vrot.lane.b32.xlu2 %v1406_v33, %s1870_s5  ;;  %1437 = vrot.lane.b32.xlu1 %v1405_v59, %s1870_s5 }
 0x44b   :  { %v1317_v8 = vpop.permute.xlu1 %1316 }
 0x44c   :  { %v1315_v3 = vpop.permute.xlu0 %1314  ;;  %v1330_v4 = vsel %vm398_vm2, %v1317_v8, %v1319_v27  ;;  %v1820_v27 = vld [vmem:[%s2871_s2 + $0x23] ss:$0 sm:$0xff] }
 0x44d   :  { %v1329_v53 = vsel %vm398_vm2, %v1313_v41, %v1315_v3  ;;  %v2719_v58 = vadd.f32 %v1330_v4, %v2633_v30  ;;  %v1819_v41 = vld [vmem:[%s2871_s2 + $0x21] ss:$0 sm:$0xff]  ;;  %s1873_s2 = smov [#allocation7]  }
 0x44e   :  { %v2722_v42 = vadd.f32 %v1329_v53, %v2625_v11  ;;  %v1387_v11 = vpop.permute.xlu2 %1386 }
 0x44f   :  { %v1412_v30 = vmul.f32 %v1387_v11, %v2510_v61 }
 0x453   :  { %v1323_v47 = vpop.permute.xlu1 %1322 }
 0x454   :  { %v1321_v56 = vpop.permute.xlu0 %1320 }
 0x455   :  { %v1331_v19 = vsel %vm398_vm2, %v1321_v56, %v1323_v47 }
 0x456   :  { %v2726_v25 = vadd.f32 %v1331_v19, %v2640_v0  ;;  %v1411_v0 = vmul.f32 %v1387_v11, %v2489_v38  ;;  %v1399_v51 = vpop.permute.xlu2 %1398 }
 0x457   :  { %v1418_v26 = vmul.f32 %v1399_v51, %v2548_v48  ;;  %v1417_v52 = vmul.f32 %v1399_v51, %v2522_v32 }
 0x45b   :  { %v1383_v39 = vpop.permute.xlu1 %1382 }
 0x45c   :  { %v1379_v40 = vpop.permute.xlu0 %1378  ;;  %v1409_v7 = vmul.f32 %v1383_v39, %v2475_v22  ;;  %v1410_v29 = vmul.f32 %v1383_v39, %v2532_v36 }
 0x45d   :  { %v1407_v60 = vmul.f32 %v1379_v40, %v2459_v34  ;;  %v1408_v63 = vmul.f32 %v1379_v40, %v2534_v54 }
 0x45e   :  { %1445 = vrot.lane.b32.xlu2 %v1409_v7, %s1870_s5 }
 0x45f   :  { %1441 = vrot.lane.b32.xlu0 %v1407_v60, %s1870_s5  ;;  %1443 = vrot.lane.b32.xlu1 %v1408_v63, %s1870_s5 }
 0x463   :  { %v1395_v20 = vpop.permute.xlu1 %1394 }
 0x464   :  { %v1391_v37 = vpop.permute.xlu0 %1390  ;;  %v1415_v17 = vmul.f32 %v1395_v20, %v2505_v57  ;;  %v1416_v16 = vmul.f32 %v1395_v20, %v2556_v2 }
 0x465   :  { %v1413_v49 = vmul.f32 %v1391_v37, %v2485_v24  ;;  %v1414_v9 = vmul.f32 %v1391_v37, %v2558_v5 }
 0x466   :  { %1451 = vrot.lane.b32.xlu2 %v1412_v30, %s1870_s5 }
 0x467   :  { %1449 = vrot.lane.b32.xlu1 %v1411_v0, %s1870_s5  ;;  %1447 = vrot.lane.b32.xlu0 %v1410_v29, %s1870_s5 }
 0x46c   :  { %v2752_v31 = vpop.permute.xlu0 %1402 }
 0x46d   :  { %v1419_v1 = vmul.f32 %v2752_v31, %v2519_v28 }
 0x46e   :  { %1457 = vrot.lane.b32.xlu2 %v1415_v17, %s1870_s5 }
 0x46f   :  { %1455 = vrot.lane.b32.xlu1 %v1414_v9, %s1870_s5  ;;  %1453 = vrot.lane.b32.xlu0 %v1413_v49, %s1870_s5 }
 0x476   :  { %1463 = vrot.lane.b32.xlu2 %v1418_v26, %s1870_s5 }
 0x477   :  { %1461 = vrot.lane.b32.xlu1 %v1417_v52, %s1870_s5  ;;  %1459 = vrot.lane.b32.xlu0 %v1416_v16, %s1870_s5 }
 0x47e   :  { %1523 = vperm.xlu2 %1745, %v1819_v41  }
 0x47f   :  { %1519 = vperm.xlu1 %1744, %v1818_v44   ;;  %1465 = vrot.lane.b32.xlu0 %v1419_v1, %s1870_s5 }
 0x486   :  { %1535 = vperm.xlu2 %1745, %v1822_v43  }
 0x487   :  { %1531 = vperm.xlu1 %1744, %v1820_v27   ;;  %1527 = vperm.xlu0 %1743, %v1821_v18   ;;  %v1420_v18 = vmul.f32 %v2752_v31, %v2574_v50 }
 0x48e   :  { %1547 = vperm.xlu2 %1745, %v1825_v62  }
 0x48f   :  { %1543 = vperm.xlu1 %1744, %v1823_v35   ;;  %1539 = vperm.xlu0 %1743, %v1824_v14  }
 0x4a1   :  { %v1440_v6 = vpop.permute.xlu2 %1439 }
 0x4b8   :  { %v1446_v59 = vpop.permute.xlu2 %1445 }
 0x4b9   :  { %v1438_v33 = vpop.permute.xlu1 %1437 }
 0x4ba   :  { %v1469_v13 = vsel %vm560_vm0, %v1438_v33, %v1440_v6 }
 0x4bb   :  { %v2783_v8 = vadd.f32 %v1469_v13, %v2694_v45 }
 0x4c0   :  { %v1452_v3 = vpop.permute.xlu2 %1451 }
 0x4c8   :  { %v1458_v4 = vpop.permute.xlu2 %1457 }
 0x4d0   :  { %v1464_v53 = vpop.permute.xlu2 %1463 }
 0x4d1   :  { %v1442_v47 = vpop.permute.xlu0 %1441  ;;  %v1444_v56 = vpop.permute.xlu1 %1443 }
 0x4d2   :  { %v1470_v19 = vsel %vm560_vm0, %v1442_v47, %v1444_v56 }
 0x4d3   :  { %v2787_v39 = vadd.f32 %v1470_v19, %v2698_v21 }
 0x4d8   :  { %v1524_v40 = vpop.permute.xlu2 %1523 }
 0x4d9   :  { %v1448_v7 = vpop.permute.xlu0 %1447  ;;  %v1552_v60 = vmul.f32 %v1524_v40, %v2459_v34  ;;  %v1450_v63 = vpop.permute.xlu1 %1449  ;;  %v1553_v44 = vmul.f32 %v1524_v40, %v2534_v54 }
 0x4da   :  { %v1471_v11 = vsel %vm560_vm0, %v1446_v59, %v1448_v7  ;;  %v1472_v45 = vsel %vm560_vm0, %v1450_v63, %v1452_v3 }
 0x4db   :  { %v2793_v30 = vadd.f32 %v1471_v11, %v2706_v12  ;;  %v2796_v0 = vadd.f32 %v1472_v45, %v2703_v55  ;;  %1586 = vrot.lane.b32.xlu2 %v1552_v60, %s1871_s1 }
 0x4e1   :  { %v1454_v29 = vpop.permute.xlu0 %1453  ;;  %v1456_v21 = vpop.permute.xlu1 %1455 }
 0x4e2   :  { %v1473_v20 = vsel %vm560_vm0, %v1454_v29, %v1456_v21 }
 0x4e3   :  { %v2801_v37 = vadd.f32 %v1473_v20, %v2712_v10 }
 0x4e9   :  { %v1460_v34 = vpop.permute.xlu0 %1459  ;;  %v1462_v17 = vpop.permute.xlu1 %1461 }
 0x4ea   :  { %v1474_v49 = vsel %vm560_vm0, %v1458_v4, %v1460_v34  ;;  %v1475_v9 = vsel %vm560_vm0, %v1462_v17, %v1464_v53 }
 0x4eb   :  { %v2806_v12 = vadd.f32 %v1474_v49, %v2722_v42  ;;  %v2809_v55 = vadd.f32 %v1475_v9, %v2719_v58 }
 0x4f1   :  { %v2811_v51 = vpop.permute.xlu0 %1465  ;;  %v1520_v26 = vpop.permute.xlu1 %1519 }
 0x4f2   :  { %v1550_v52 = vmul.f32 %v1520_v26, %v2447_v46  ;;  %v1551_v10 = vmul.f32 %v1520_v26, %v2493_v15  ;;  %v1536_v46 = vpop.permute.xlu2 %1535 }
 0x4f3   :  { %v1558_v15 = vmul.f32 %v1536_v46, %v2485_v24  ;;  %v1559_v27 = vmul.f32 %v1536_v46, %v2558_v5 }
 0x4f4   :  { %1584 = vrot.lane.b32.xlu1 %v1551_v10, %s1871_s1  ;;  %1582 = vrot.lane.b32.xlu0 %v1550_v52, %s1871_s1 }
 0x4f9   :  { %v1528_v16 = vpop.permute.xlu0 %1527  ;;  %v1532_v58 = vpop.permute.xlu1 %1531 }
 0x4fa   :  { %v1554_v41 = vmul.f32 %v1528_v16, %v2475_v22  ;;  %v1555_v42 = vmul.f32 %v1528_v16, %v2532_v36  ;;  %v1557_v1 = vmul.f32 %v1532_v58, %v2510_v61  ;;  %v1556_v43 = vmul.f32 %v1532_v58, %v2489_v38 }
 0x4fc   :  { %1592 = vrot.lane.b32.xlu2 %v1555_v42, %s1871_s1  ;;  %1590 = vrot.lane.b32.xlu1 %v1554_v41, %s1871_s1 }
 0x4fd   :  { %1588 = vrot.lane.b32.xlu0 %v1553_v44, %s1871_s1 }
 0x501   :  { %v1540_v22 = vpop.permute.xlu0 %1539  ;;  %v1544_v24 = vpop.permute.xlu1 %1543 }
 0x502   :  { %v1560_v36 = vmul.f32 %v1540_v22, %v2505_v57  ;;  %v1561_v54 = vmul.f32 %v1540_v22, %v2556_v2  ;;  %v1562_v38 = vmul.f32 %v1544_v24, %v2522_v32  ;;  %v1563_v61 = vmul.f32 %v1544_v24, %v2548_v48  ;;  %v1548_v57 = vpop.permute.xlu2 %1547 }
 0x503   :  { %v1565_v2 = vmul.f32 %v1548_v57, %v2574_v50  ;;  %v1564_v5 = vmul.f32 %v1548_v57, %v2519_v28 }
 0x504   :  { %1598 = vrot.lane.b32.xlu2 %v1558_v15, %s1871_s1  ;;  %1596 = vrot.lane.b32.xlu1 %v1557_v1, %s1871_s1 }
 0x505   :  { %1594 = vrot.lane.b32.xlu0 %v1556_v43, %s1871_s1 }
 0x50c   :  { %1604 = vrot.lane.b32.xlu2 %v1561_v54, %s1871_s1  ;;  %1602 = vrot.lane.b32.xlu1 %v1560_v36, %s1871_s1 }
 0x50d   :  { %1600 = vrot.lane.b32.xlu0 %v1559_v27, %s1871_s1 }
 0x514   :  { %1608 = vrot.lane.b32.xlu2 %v1563_v61, %s1871_s1  ;;  %1606 = vrot.lane.b32.xlu1 %v1562_v38, %s1871_s1 }
 0x515   :  { %1467 = vrot.lane.b32.xlu0 %v1420_v18, %s1870_s5  ;;  %s1657_s5 = sshll.u32 %s1873_s2, 4  ;;  %s1658_s5 = int_to_ptr.vmem [resolvable:$true] %s1657_s5 }
 0x51c   :  { %1612 = vrot.lane.b32.xlu1 %v1565_v2, %s1871_s1 }
 0x51d   :  { %1610 = vrot.lane.b32.xlu0 %v1564_v5, %s1871_s1 }
 0x535   :  { %v1587_v32 = vpop.permute.xlu2 %1586 }
 0x556   :  { %v1593_v35 = vpop.permute.xlu2 %1592 }
 0x55e   :  { %v1599_v13 = vpop.permute.xlu2 %1598 }
 0x566   :  { %v1583_v48 = vpop.permute.xlu0 %1582  ;;  %v1585_v62 = vpop.permute.xlu1 %1584 }
 0x567   :  { %v1614_v31 = vsel %vm722_vm3, %v1583_v48, %v1585_v62  ;;  %v1605_v60 = vpop.permute.xlu2 %1604 }
 0x568   :  { %v1630_v50 = vadd.f32 %v1614_v31, %v2783_v8 }
 0x56e   :  { %v1591_v6 = vpop.permute.xlu1 %1590 }
 0x56f   :  { %v1589_v14 = vpop.permute.xlu0 %1588  ;;  %v1616_v33 = vsel %vm722_vm3, %v1591_v6, %v1593_v35  ;;  %v1609_v20 = vpop.permute.xlu2 %1608 }
 0x570   :  { %v1615_v59 = vsel %vm722_vm3, %v1587_v32, %v1589_v14  ;;  %v1632_v4 = vadd.f32 %v1616_v33, %v2793_v30 }
 0x571   :  { %v1631_v28 = vadd.f32 %v1615_v59, %v2787_v39 }
 0x573   :  { %v1638_v3 = vadd.f32 %v1631_v28, %v1630_v50 }
 0x575   :  { %v1639_v53 = vadd.f32 %v1638_v3, %v1632_v4 }
 0x576   :  { %v1597_v56 = vpop.permute.xlu1 %1596 }
 0x577   :  { %v1595_v47 = vpop.permute.xlu0 %1594 }
 0x578   :  { %v1617_v19 = vsel %vm722_vm3, %v1595_v47, %v1597_v56 }
 0x579   :  { %v1633_v40 = vadd.f32 %v1617_v19, %v2796_v0 }
 0x57b   :  { %v1640_v7 = vadd.f32 %v1639_v53, %v1633_v40 }
 0x57e   :  { %v1603_v11 = vpop.permute.xlu1 %1602 }
 0x57f   :  { %v1601_v63 = vpop.permute.xlu0 %1600  ;;  %v1619_v8 = vsel %vm722_vm3, %v1603_v11, %v1605_v60 }
 0x580   :  { %v1618_v45 = vsel %vm722_vm3, %v1599_v13, %v1601_v63  ;;  %v1635_v30 = vadd.f32 %v1619_v8, %v2806_v12 }
 0x581   :  { %v1634_v39 = vadd.f32 %v1618_v45, %v2801_v37 }
 0x583   :  { %v1641_v29 = vadd.f32 %v1640_v7, %v1634_v39 }
 0x585   :  { %v1642_v21 = vadd.f32 %v1641_v29, %v1635_v30 }
 0x586   :  { %v1607_v17 = vpop.permute.xlu1 %1606 }
 0x587   :  { %v1468_v34 = vpop.permute.xlu0 %1467  ;;  %v1620_v49 = vsel %vm722_vm3, %v1607_v17, %v1609_v20 }
 0x588   :  { %v1636_v0 = vadd.f32 %v1620_v49, %v2809_v55  ;;  %v1476_v26 = vsel %vm560_vm0, %v2811_v51, %v1468_v34 }
 0x589   :  { %v1492_v52 = vadd.f32 %v1476_v26, %v2726_v25 }
 0x58a   :  { %v1643_v9 = vadd.f32 %v1642_v21, %v1636_v0 }
 0x58e   :  { %v1613_v16 = vpop.permute.xlu1 %1612 }
 0x58f   :  { %v1611_v10 = vpop.permute.xlu0 %1610 }
 0x590   :  { %v1621_v37 = vsel %vm722_vm3, %v1611_v10, %v1613_v16 }
 0x591   :  { %v1637_v12 = vadd.f32 %v1621_v37, %v1492_v52 }
 0x593   :  { %v1644_v55 = vadd.f32 %v1643_v9, %v1637_v12 }
 0x595   :  { %v1648_v25 = vsel %vm1647_vm11, %v1644_v55, 0.0 }
 0x596   :  { %1649 = vst [vmem:[#allocation7] sm:$0xff] %v1648_v25 }
 0x597   :  { %1662 = dma.vmem_to_hbm [thread:$0]  %s1658_s5, 128, %s1660_s29, [#allocation5]  }
 0x598   :  { %1864 = dma.done.wait [#allocation5], 128  }
 0x599   :  { %1865 = vsyncadd [#allocation5], 4294967168 }
 0x59a   :  { %1667 = vsyncpa [#allocation5], 1 }
 0x59b   :  { %1668 = vsyncpa [#allocation6], 1 }

</bundles_post_ra>
